<compile_context>
chip_gen: v7x
topology: tpu7x:2x2x1
jax: 0.10.0
libtpu: 0.0.40
codegen_flags: <defaults>
</compile_context>

<pallas_src>
import jax
import jax.numpy as jnp
import numpy as np
from jax.experimental import pallas as pl
from jax.experimental.pallas import tpu as pltpu


def _round_up(x, m):
    return (x + m - 1) // m * m


def _taps(ksize):
    r = ksize // 2
    return tuple((oy, ox) for oy in range(-r, r + 1) for ox in range(-r, r + 1))


def _edge_masks(H, W, ksize):
    """(k*k, H*W) float32 0/1 masks implementing the conv's zero padding per tap."""
    taps = _taps(ksize)
    m = np.zeros((len(taps), H, W), np.float32)
    for t, (oy, ox) in enumerate(taps):
        ys = slice(max(0, -oy), min(H, H - oy))
        xs = slice(max(0, -ox), min(W, W - ox))
        m[t, ys, xs] = 1.0
    return m.reshape(len(taps), H * W)


def _build_rdb_kernel(n_dense, in_ch, growth, out_ch, H, W, ksize, slot_off, c_patch):
    """Fused RDB kernel body; one grid step == one batch element."""
    HW = H * W
    taps = _taps(ksize)

    def kernel(*refs):
        x_ref, mask_ref = refs[0], refs[1]
        i = 2
        w3_refs = refs[i:i + n_dense]; i += n_dense            # (growth, k*k*c_patch)
        b_refs = refs[i:i + n_dense]; i += n_dense             # (growth, 1)
        w1_refs = refs[i:i + n_dense + 1]; i += n_dense + 1    # (out_ch, block)
        o_ref = refs[i]                                        # (1, out_ch, HW)
        patch_ref = refs[i + 1]                                # VMEM (k*k*c_patch, HW)

        # Clear the im2col scratch so uninitialised VMEM (possibly NaN) can never leak
        # through the zero-weight-padded K columns.  Cheap single-tile memset.
        patch_ref[...] = jnp.zeros_like(patch_ref)

        def scatter_taps(vals, slot):
            """Write the k*k rolled + edge-masked copies of `vals` into its patch slot."""
            nc = vals.shape[0]
            for t, (oy, ox) in enumerate(taps):
                s = oy * W + ox                                # static flat-pixel shift
                rolled = vals if s == 0 else pltpu.roll(vals, (-s) % HW, axis=1)
                r0 = t * c_patch + slot                        # 8-aligned by construction
                patch_ref[r0:r0 + nc, :] = rolled * mask_ref[t:t + 1, :]

        x = x_ref[0]                                           # (in_ch, HW), lane-dense
        # Final 1x1 conv (bias-free), accumulated incrementally; start with the raw
        # input channels' contribution.
        y = jnp.dot(w1_refs[0][...], x, preferred_element_type=jnp.float32)

        new_vals = x
        for l in range(n_dense):
            # Channels appended just before layer l enter the im2col buffer exactly once.
            scatter_taps(new_vals, slot_off[l])
            # conv3x3 + bias as ONE wide-K matmul; K columns this layer does not see
            # carry zero weights (and zeroed patch rows).
            acc = jnp.broadcast_to(b_refs[l][...], (growth, HW))      # bias-initialised
            acc = acc + jnp.dot(w3_refs[l][...], patch_ref[...],
                                preferred_element_type=jnp.float32)
            out = jnp.maximum(acc, 0.0)                               # ReLU
            # This layer's contribution to the final 1x1 conv.
            y = y + jnp.dot(w1_refs[l + 1][...], out,
                            preferred_element_type=jnp.float32)
            new_vals = out

        o_ref[0] = y.astype(o_ref.dtype)

    return kernel


@jax.jit
def rdb_forward(params, x_nchw):
    """Forward pass equivalent to RDB.forward (NCHW in, NCHW out, float32)."""
    dense_w, dense_b, w1x1 = params["dense_w"], params["dense_b"], params["w1x1"]
    n_dense = len(dense_w)
    growth, in_ch, kh, kw = dense_w[0].shape
    out_ch = w1x1.shape[0]
    N, C, H, W = x_nchw.shape
    assert C == in_ch and kh == kw and kh % 2 == 1
    ksize = kh
    HW = H * W
    n_taps = ksize * ksize

    # Fixed-stride, 8-sublane-aligned channel slots of the per-tap im2col buffer.
    # Only channel groups that feed a 3x3 conv get a slot (the last layer's output
    # only feeds the 1x1 conv).
    blocks = [in_ch] + [growth] * (n_dense - 1)
    slot_off, off = [], 0
    for blk in blocks:
        slot_off.append(off)
        off += _round_up(blk, 8)
    c_patch = off

    # Host-side weight prep: (growth, Cin_l, k, k) -> (growth, k*k*c_patch) with each
    # source block's channels placed at its fixed slot and zeros elsewhere.
    w3_list = []
    for l, w in enumerate(dense_w):
        g, cin_l = w.shape[0], w.shape[1]
        wt = jnp.transpose(w, (0, 2, 3, 1)).reshape(g, n_taps, cin_l)
        w_full = jnp.zeros((g, n_taps, c_patch), jnp.float32)
        for j in range(l + 1):
            c_lo = 0 if j == 0 else in_ch + (j - 1) * growth
            w_full = w_full.at[:, :, slot_off[j]:slot_off[j] + blocks[j]].set(
                wt[:, :, c_lo:c_lo + blocks[j]])
        w3_list.append(w_full.reshape(g, n_taps * c_patch))
    b_list = [b.reshape(growth, 1).astype(jnp.float32) for b in dense_b]
    # Split the 1x1 weight per source block so the kernel never slices lanes.
    w1_parts = [w1x1[:, 0:in_ch]] + [
        w1x1[:, in_ch + l * growth: in_ch + (l + 1) * growth] for l in range(n_dense)]

    masks = jnp.asarray(_edge_masks(H, W, ksize))               # (k*k, HW), static 0/1

    x_flat = x_nchw.reshape(N, C, HW)        # lane-dense pixels; no transpose needed

    kernel = _build_rdb_kernel(n_dense, in_ch, growth, out_ch, H, W, ksize,
                               tuple(slot_off), c_patch)

    rep2 = lambda n: (0, 0)                                      # grid-invariant operands
    out = pl.pallas_call(
        kernel,
        out_shape=jax.ShapeDtypeStruct((N, out_ch, HW), jnp.float32),
        grid=(N,),
        in_specs=(
            [pl.BlockSpec((1, C, HW), lambda n: (n, 0, 0)),
             pl.BlockSpec((n_taps, HW), rep2)]
            + [pl.BlockSpec(w.shape, rep2) for w in w3_list]
            + [pl.BlockSpec(b.shape, rep2) for b in b_list]
            + [pl.BlockSpec(w.shape, rep2) for w in w1_parts]),
        out_specs=pl.BlockSpec((1, out_ch, HW), lambda n: (n, 0, 0)),
        scratch_shapes=[pltpu.VMEM((n_taps * c_patch, HW), jnp.float32)],
        compiler_params=pltpu.CompilerParams(
            dimension_semantics=("parallel",)),
        # TODO(synk): for real SR resolutions add spatial tiling (grid over row blocks
        # with a 1-row halo) so the im2col scratch fits v7x's 32 MiB scoped VMEM; at
        # these sizes a whole image easily fits.
    )(x_flat, masks, *w3_list, *b_list, *w1_parts)

    return out.reshape(N, out_ch, H, W)


def init_rdb_params(key, in_channels, out_channels, n_dense, growth, ksize=3):
    """Synthetic params in PyTorch layouts: conv3x3 (Cout,Cin,kH,kW), conv1x1 (Cout,Cin)."""
    dense_w, dense_b = [], []
    c = in_channels
    for _ in range(n_dense):
        key, k_w, k_b = jax.random.split(key, 3)
        dense_w.append(0.1 * jax.random.normal(k_w, (growth, c, ksize, ksize), jnp.float32))
        dense_b.append(0.1 * jax.random.normal(k_b, (growth,), jnp.float32))
        c += growth
    key, k_w = jax.random.split(key)
    w1x1 = 0.1 * jax.random.normal(k_w, (out_channels, c), jnp.float32)
    return {"dense_w": dense_w, "dense_b": dense_b, "w1x1": w1x1}


def rdb_reference(params, x_nchw):
    """Pure-JAX reference identical to the PyTorch RDB (numerical self-check)."""
    feat = x_nchw
    for w, b in zip(params["dense_w"], params["dense_b"]):
        out = jax.lax.conv_general_dilated(
            feat, w, window_strides=(1, 1), padding="SAME",
            dimension_numbers=("NCHW", "OIHW", "NCHW"),
            precision=jax.lax.Precision.HIGHEST)
        out = jax.nn.relu(out + b[None, :, None, None])
        feat = jnp.concatenate([feat, out], axis=1)
    w1 = params["w1x1"][:, :, None, None]
    return jax.lax.conv_general_dilated(
        feat, w1, window_strides=(1, 1), padding="VALID",
        dimension_numbers=("NCHW", "OIHW", "NCHW"),
        precision=jax.lax.Precision.HIGHEST)


if __name__ == "__main__":
    # RDB(inChannels=4, outChannels=4, nDenseLayer=3, GrowthRate=8) at 16x16, batch 2.
    N, C_IN, H, W = 2, 4, 16, 16
    C_OUT, N_DENSE, GROWTH = 4, 3, 8

    key = jax.random.PRNGKey(0)
    key, kx, kp = jax.random.split(key, 3)
    x = jax.random.normal(kx, (N, C_IN, H, W), jnp.float32)   # NCHW, like PyTorch
    params = init_rdb_params(kp, C_IN, C_OUT, N_DENSE, GROWTH)

    y = jax.block_until_ready(rdb_forward(params, x))
    assert y.shape == (N, C_OUT, H, W), y.shape

    # Numerical self-check against the pure-JAX reference of the PyTorch module.
    y_ref = jax.block_until_ready(rdb_reference(params, x))
    np.testing.assert_allclose(np.asarray(y), np.asarray(y_ref), rtol=1e-2, atol=1e-2)

    print("KERNEL_OK")
</pallas_src>

<mosaic_0001>
module attributes {stable_mosaic.version = 11 : i64} {
  func.func @kernel(%arg0: i32, %arg1: memref<1x4x256xf32, #tpu.memory_space<vmem>>, %arg2: memref<9x256xf32, #tpu.memory_space<vmem>>, %arg3: memref<8x216xf32, #tpu.memory_space<vmem>>, %arg4: memref<8x216xf32, #tpu.memory_space<vmem>>, %arg5: memref<8x216xf32, #tpu.memory_space<vmem>>, %arg6: memref<8x1xf32, #tpu.memory_space<vmem>>, %arg7: memref<8x1xf32, #tpu.memory_space<vmem>>, %arg8: memref<8x1xf32, #tpu.memory_space<vmem>>, %arg9: memref<4x4xf32, #tpu.memory_space<vmem>>, %arg10: memref<4x8xf32, #tpu.memory_space<vmem>>, %arg11: memref<4x8xf32, #tpu.memory_space<vmem>>, %arg12: memref<4x8xf32, #tpu.memory_space<vmem>>, %arg13: memref<1x4x256xf32, #tpu.memory_space<vmem>>, %arg14: memref<216x256xf32, #tpu.memory_space<vmem>>) attributes {dimension_semantics = [#tpu.dimension_semantics<parallel>], iteration_bounds = array<i64: 2>, scalar_prefetch = 0 : i64, scratch_operands = 1 : i64, tpu.core_type = #tpu.core_type<tc>, window_params = [{transform_indices = @transform_0, window_bounds = array<i64: 1, 4, 256>}, {pipeline_mode = #tpu.pipeline_mode<synchronous>, transform_indices = @transform_1, window_bounds = array<i64: 9, 256>}, {pipeline_mode = #tpu.pipeline_mode<synchronous>, transform_indices = @transform_2, window_bounds = array<i64: 8, 216>}, {pipeline_mode = #tpu.pipeline_mode<synchronous>, transform_indices = @transform_3, window_bounds = array<i64: 8, 216>}, {pipeline_mode = #tpu.pipeline_mode<synchronous>, transform_indices = @transform_4, window_bounds = array<i64: 8, 216>}, {pipeline_mode = #tpu.pipeline_mode<synchronous>, transform_indices = @transform_5, window_bounds = array<i64: 8, 1>}, {pipeline_mode = #tpu.pipeline_mode<synchronous>, transform_indices = @transform_6, window_bounds = array<i64: 8, 1>}, {pipeline_mode = #tpu.pipeline_mode<synchronous>, transform_indices = @transform_7, window_bounds = array<i64: 8, 1>}, {pipeline_mode = #tpu.pipeline_mode<synchronous>, transform_indices = @transform_8, window_bounds = array<i64: 4, 4>}, {pipeline_mode = #tpu.pipeline_mode<synchronous>, transform_indices = @transform_9, window_bounds = array<i64: 4, 8>}, {pipeline_mode = #tpu.pipeline_mode<synchronous>, transform_indices = @transform_10, window_bounds = array<i64: 4, 8>}, {pipeline_mode = #tpu.pipeline_mode<synchronous>, transform_indices = @transform_11, window_bounds = array<i64: 4, 8>}, {transform_indices = @transform_12, window_bounds = array<i64: 1, 4, 256>}]} {
    %cst = arith.constant 0.000000e+00 : f32
    %0 = vector.broadcast %cst : f32 to vector<216x256xf32>
    %c0 = arith.constant 0 : index
    %c0_0 = arith.constant 0 : index
    %1 = vector.load %arg14[%c0, %c0_0] : memref<216x256xf32, #tpu.memory_space<vmem>>, vector<216x256xf32>
    tpu.vector_store %arg14[%c0, %c0_0], %0 {strides = array<i32>} : memref<216x256xf32, #tpu.memory_space<vmem>>, vector<216x256xf32>,
    %c0_1 = arith.constant 0 : index
    %c0_2 = arith.constant 0 : index
    %c0_3 = arith.constant 0 : index
    %2 = vector.load %arg1[%c0_1, %c0_2, %c0_3] : memref<1x4x256xf32, #tpu.memory_space<vmem>>, vector<1x4x256xf32>
    %3 = vector.shape_cast %2 : vector<1x4x256xf32> to vector<4x256xf32>
    %c0_4 = arith.constant 0 : index
    %c0_5 = arith.constant 0 : index
    %4 = vector.load %arg9[%c0_4, %c0_5] : memref<4x4xf32, #tpu.memory_space<vmem>>, vector<4x4xf32>
    %cst_6 = arith.constant dense<0.000000e+00> : vector<4x256xf32>
    %5 = tpu.matmul %4, %3, %cst_6 {dimension_numbers = #tpu.dot_dimension_numbers<[1], [0], [0], [1], [0, 0, 1, 1], [], []>} : vector<4x4xf32>, vector<4x256xf32>, vector<4x256xf32> -> vector<4x256xf32>
    %c17_i32 = arith.constant 17 : i32
    %6 = tpu.dynamic_rotate %3 by %c17_i32 dim 1 : vector<4x256xf32>, i32 -> vector<4x256xf32>
    %c0_7 = arith.constant 0 : index
    %c0_8 = arith.constant 0 : index
    %7 = vector.load %arg2[%c0_7, %c0_8] : memref<9x256xf32, #tpu.memory_space<vmem>>, vector<1x256xf32>
    %8 = vector.broadcast %7 : vector<1x256xf32> to vector<4x256xf32>
    %9 = arith.mulf %6, %8 : vector<4x256xf32>
    %c0_9 = arith.constant 0 : index
    %c0_10 = arith.constant 0 : index
    %10 = vector.load %arg14[%c0_9, %c0_10] : memref<216x256xf32, #tpu.memory_space<vmem>>, vector<4x256xf32>
    tpu.vector_store %arg14[%c0_9, %c0_10], %9 {strides = array<i32>} : memref<216x256xf32, #tpu.memory_space<vmem>>, vector<4x256xf32>,
    %c16_i32 = arith.constant 16 : i32
    %11 = tpu.dynamic_rotate %3 by %c16_i32 dim 1 : vector<4x256xf32>, i32 -> vector<4x256xf32>
    %c1 = arith.constant 1 : index
    %c0_11 = arith.constant 0 : index
    %12 = vector.load %arg2[%c1, %c0_11] : memref<9x256xf32, #tpu.memory_space<vmem>>, vector<1x256xf32>
    %13 = vector.broadcast %12 : vector<1x256xf32> to vector<4x256xf32>
    %14 = arith.mulf %11, %13 : vector<4x256xf32>
    %c24 = arith.constant 24 : index
    %c0_12 = arith.constant 0 : index
    %15 = vector.load %arg14[%c24, %c0_12] : memref<216x256xf32, #tpu.memory_space<vmem>>, vector<4x256xf32>
    tpu.vector_store %arg14[%c24, %c0_12], %14 {strides = array<i32>} : memref<216x256xf32, #tpu.memory_space<vmem>>, vector<4x256xf32>,
    %c15_i32 = arith.constant 15 : i32
    %16 = tpu.dynamic_rotate %3 by %c15_i32 dim 1 : vector<4x256xf32>, i32 -> vector<4x256xf32>
    %c2 = arith.constant 2 : index
    %c0_13 = arith.constant 0 : index
    %17 = vector.load %arg2[%c2, %c0_13] : memref<9x256xf32, #tpu.memory_space<vmem>>, vector<1x256xf32>
    %18 = vector.broadcast %17 : vector<1x256xf32> to vector<4x256xf32>
    %19 = arith.mulf %16, %18 : vector<4x256xf32>
    %c48 = arith.constant 48 : index
    %c0_14 = arith.constant 0 : index
    %20 = vector.load %arg14[%c48, %c0_14] : memref<216x256xf32, #tpu.memory_space<vmem>>, vector<4x256xf32>
    tpu.vector_store %arg14[%c48, %c0_14], %19 {strides = array<i32>} : memref<216x256xf32, #tpu.memory_space<vmem>>, vector<4x256xf32>,
    %c1_i32 = arith.constant 1 : i32
    %21 = tpu.dynamic_rotate %3 by %c1_i32 dim 1 : vector<4x256xf32>, i32 -> vector<4x256xf32>
    %c3 = arith.constant 3 : index
    %c0_15 = arith.constant 0 : index
    %22 = vector.load %arg2[%c3, %c0_15] : memref<9x256xf32, #tpu.memory_space<vmem>>, vector<1x256xf32>
    %23 = vector.broadcast %22 : vector<1x256xf32> to vector<4x256xf32>
    %24 = arith.mulf %21, %23 : vector<4x256xf32>
    %c72 = arith.constant 72 : index
    %c0_16 = arith.constant 0 : index
    %25 = vector.load %arg14[%c72, %c0_16] : memref<216x256xf32, #tpu.memory_space<vmem>>, vector<4x256xf32>
    tpu.vector_store %arg14[%c72, %c0_16], %24 {strides = array<i32>} : memref<216x256xf32, #tpu.memory_space<vmem>>, vector<4x256xf32>,
    %c4 = arith.constant 4 : index
    %c0_17 = arith.constant 0 : index
    %26 = vector.load %arg2[%c4, %c0_17] : memref<9x256xf32, #tpu.memory_space<vmem>>, vector<1x256xf32>
    %27 = vector.broadcast %26 : vector<1x256xf32> to vector<4x256xf32>
    %28 = arith.mulf %3, %27 : vector<4x256xf32>
    %c96 = arith.constant 96 : index
    %c0_18 = arith.constant 0 : index
    %29 = vector.load %arg14[%c96, %c0_18] : memref<216x256xf32, #tpu.memory_space<vmem>>, vector<4x256xf32>
    tpu.vector_store %arg14[%c96, %c0_18], %28 {strides = array<i32>} : memref<216x256xf32, #tpu.memory_space<vmem>>, vector<4x256xf32>,
    %c255_i32 = arith.constant 255 : i32
    %30 = tpu.dynamic_rotate %3 by %c255_i32 dim 1 : vector<4x256xf32>, i32 -> vector<4x256xf32>
    %c5 = arith.constant 5 : index
    %c0_19 = arith.constant 0 : index
    %31 = vector.load %arg2[%c5, %c0_19] : memref<9x256xf32, #tpu.memory_space<vmem>>, vector<1x256xf32>
    %32 = vector.broadcast %31 : vector<1x256xf32> to vector<4x256xf32>
    %33 = arith.mulf %30, %32 : vector<4x256xf32>
    %c120 = arith.constant 120 : index
    %c0_20 = arith.constant 0 : index
    %34 = vector.load %arg14[%c120, %c0_20] : memref<216x256xf32, #tpu.memory_space<vmem>>, vector<4x256xf32>
    tpu.vector_store %arg14[%c120, %c0_20], %33 {strides = array<i32>} : memref<216x256xf32, #tpu.memory_space<vmem>>, vector<4x256xf32>,
    %c241_i32 = arith.constant 241 : i32
    %35 = tpu.dynamic_rotate %3 by %c241_i32 dim 1 : vector<4x256xf32>, i32 -> vector<4x256xf32>
    %c6 = arith.constant 6 : index
    %c0_21 = arith.constant 0 : index
    %36 = vector.load %arg2[%c6, %c0_21] : memref<9x256xf32, #tpu.memory_space<vmem>>, vector<1x256xf32>
    %37 = vector.broadcast %36 : vector<1x256xf32> to vector<4x256xf32>
    %38 = arith.mulf %35, %37 : vector<4x256xf32>
    %c144 = arith.constant 144 : index
    %c0_22 = arith.constant 0 : index
    %39 = vector.load %arg14[%c144, %c0_22] : memref<216x256xf32, #tpu.memory_space<vmem>>, vector<4x256xf32>
    tpu.vector_store %arg14[%c144, %c0_22], %38 {strides = array<i32>} : memref<216x256xf32, #tpu.memory_space<vmem>>, vector<4x256xf32>,
    %c240_i32 = arith.constant 240 : i32
    %40 = tpu.dynamic_rotate %3 by %c240_i32 dim 1 : vector<4x256xf32>, i32 -> vector<4x256xf32>
    %c7 = arith.constant 7 : index
    %c0_23 = arith.constant 0 : index
    %41 = vector.load %arg2[%c7, %c0_23] : memref<9x256xf32, #tpu.memory_space<vmem>>, vector<1x256xf32>
    %42 = vector.broadcast %41 : vector<1x256xf32> to vector<4x256xf32>
    %43 = arith.mulf %40, %42 : vector<4x256xf32>
    %c168 = arith.constant 168 : index
    %c0_24 = arith.constant 0 : index
    %44 = vector.load %arg14[%c168, %c0_24] : memref<216x256xf32, #tpu.memory_space<vmem>>, vector<4x256xf32>
    tpu.vector_store %arg14[%c168, %c0_24], %43 {strides = array<i32>} : memref<216x256xf32, #tpu.memory_space<vmem>>, vector<4x256xf32>,
    %c239_i32 = arith.constant 239 : i32
    %45 = tpu.dynamic_rotate %3 by %c239_i32 dim 1 : vector<4x256xf32>, i32 -> vector<4x256xf32>
    %c8 = arith.constant 8 : index
    %c0_25 = arith.constant 0 : index
    %46 = vector.load %arg2[%c8, %c0_25] : memref<9x256xf32, #tpu.memory_space<vmem>>, vector<1x256xf32>
    %47 = vector.broadcast %46 : vector<1x256xf32> to vector<4x256xf32>
    %48 = arith.mulf %45, %47 : vector<4x256xf32>
    %c192 = arith.constant 192 : index
    %c0_26 = arith.constant 0 : index
    %49 = vector.load %arg14[%c192, %c0_26] : memref<216x256xf32, #tpu.memory_space<vmem>>, vector<4x256xf32>
    tpu.vector_store %arg14[%c192, %c0_26], %48 {strides = array<i32>} : memref<216x256xf32, #tpu.memory_space<vmem>>, vector<4x256xf32>,
    %c0_27 = arith.constant 0 : index
    %c0_28 = arith.constant 0 : index
    %50 = vector.load %arg6[%c0_27, %c0_28] : memref<8x1xf32, #tpu.memory_space<vmem>>, vector<8x1xf32>
    %51 = vector.shape_cast %50 : vector<8x1xf32> to vector<8x1xf32>
    %52 = vector.broadcast %51 : vector<8x1xf32> to vector<8x256xf32>
    %c0_29 = arith.constant 0 : index
    %c0_30 = arith.constant 0 : index
    %53 = vector.load %arg3[%c0_29, %c0_30] : memref<8x216xf32, #tpu.memory_space<vmem>>, vector<8x216xf32>
    %c0_31 = arith.constant 0 : index
    %c0_32 = arith.constant 0 : index
    %54 = vector.load %arg14[%c0_31, %c0_32] : memref<216x256xf32, #tpu.memory_space<vmem>>, vector<216x256xf32>
    %cst_33 = arith.constant dense<0.000000e+00> : vector<8x256xf32>
    %55 = tpu.matmul %53, %54, %cst_33 {dimension_numbers = #tpu.dot_dimension_numbers<[1], [0], [0], [1], [0, 0, 1, 1], [], []>} : vector<8x216xf32>, vector<216x256xf32>, vector<8x256xf32> -> vector<8x256xf32>
    %56 = arith.addf %52, %55 : vector<8x256xf32>
    %cst_34 = arith.constant 0.000000e+00 : f32
    %57 = vector.broadcast %cst_34 : f32 to vector<8x256xf32>
    %58 = arith.maximumf %56, %57 : vector<8x256xf32>
    %c0_35 = arith.constant 0 : index
    %c0_36 = arith.constant 0 : index
    %59 = vector.load %arg10[%c0_35, %c0_36] : memref<4x8xf32, #tpu.memory_space<vmem>>, vector<4x8xf32>
    %cst_37 = arith.constant dense<0.000000e+00> : vector<4x256xf32>
    %60 = tpu.matmul %59, %58, %cst_37 {dimension_numbers = #tpu.dot_dimension_numbers<[1], [0], [0], [1], [0, 0, 1, 1], [], []>} : vector<4x8xf32>, vector<8x256xf32>, vector<4x256xf32> -> vector<4x256xf32>
    %61 = arith.addf %5, %60 : vector<4x256xf32>
    %c17_i32_38 = arith.constant 17 : i32
    %62 = tpu.dynamic_rotate %58 by %c17_i32_38 dim 1 : vector<8x256xf32>, i32 -> vector<8x256xf32>
    %c0_39 = arith.constant 0 : index
    %c0_40 = arith.constant 0 : index
    %63 = vector.load %arg2[%c0_39, %c0_40] : memref<9x256xf32, #tpu.memory_space<vmem>>, vector<1x256xf32>
    %64 = vector.broadcast %63 : vector<1x256xf32> to vector<8x256xf32>
    %65 = arith.mulf %62, %64 : vector<8x256xf32>
    %c8_41 = arith.constant 8 : index
    %c0_42 = arith.constant 0 : index
    %66 = vector.load %arg14[%c8_41, %c0_42] : memref<216x256xf32, #tpu.memory_space<vmem>>, vector<8x256xf32>
    tpu.vector_store %arg14[%c8_41, %c0_42], %65 {strides = array<i32>} : memref<216x256xf32, #tpu.memory_space<vmem>>, vector<8x256xf32>,
    %c16_i32_43 = arith.constant 16 : i32
    %67 = tpu.dynamic_rotate %58 by %c16_i32_43 dim 1 : vector<8x256xf32>, i32 -> vector<8x256xf32>
    %c1_44 = arith.constant 1 : index
    %c0_45 = arith.constant 0 : index
    %68 = vector.load %arg2[%c1_44, %c0_45] : memref<9x256xf32, #tpu.memory_space<vmem>>, vector<1x256xf32>
    %69 = vector.broadcast %68 : vector<1x256xf32> to vector<8x256xf32>
    %70 = arith.mulf %67, %69 : vector<8x256xf32>
    %c32 = arith.constant 32 : index
    %c0_46 = arith.constant 0 : index
    %71 = vector.load %arg14[%c32, %c0_46] : memref<216x256xf32, #tpu.memory_space<vmem>>, vector<8x256xf32>
    tpu.vector_store %arg14[%c32, %c0_46], %70 {strides = array<i32>} : memref<216x256xf32, #tpu.memory_space<vmem>>, vector<8x256xf32>,
    %c15_i32_47 = arith.constant 15 : i32
    %72 = tpu.dynamic_rotate %58 by %c15_i32_47 dim 1 : vector<8x256xf32>, i32 -> vector<8x256xf32>
    %c2_48 = arith.constant 2 : index
    %c0_49 = arith.constant 0 : index
    %73 = vector.load %arg2[%c2_48, %c0_49] : memref<9x256xf32, #tpu.memory_space<vmem>>, vector<1x256xf32>
    %74 = vector.broadcast %73 : vector<1x256xf32> to vector<8x256xf32>
    %75 = arith.mulf %72, %74 : vector<8x256xf32>
    %c56 = arith.constant 56 : index
    %c0_50 = arith.constant 0 : index
    %76 = vector.load %arg14[%c56, %c0_50] : memref<216x256xf32, #tpu.memory_space<vmem>>, vector<8x256xf32>
    tpu.vector_store %arg14[%c56, %c0_50], %75 {strides = array<i32>} : memref<216x256xf32, #tpu.memory_space<vmem>>, vector<8x256xf32>,
    %c1_i32_51 = arith.constant 1 : i32
    %77 = tpu.dynamic_rotate %58 by %c1_i32_51 dim 1 : vector<8x256xf32>, i32 -> vector<8x256xf32>
    %c3_52 = arith.constant 3 : index
    %c0_53 = arith.constant 0 : index
    %78 = vector.load %arg2[%c3_52, %c0_53] : memref<9x256xf32, #tpu.memory_space<vmem>>, vector<1x256xf32>
    %79 = vector.broadcast %78 : vector<1x256xf32> to vector<8x256xf32>
    %80 = arith.mulf %77, %79 : vector<8x256xf32>
    %c80 = arith.constant 80 : index
    %c0_54 = arith.constant 0 : index
    %81 = vector.load %arg14[%c80, %c0_54] : memref<216x256xf32, #tpu.memory_space<vmem>>, vector<8x256xf32>
    tpu.vector_store %arg14[%c80, %c0_54], %80 {strides = array<i32>} : memref<216x256xf32, #tpu.memory_space<vmem>>, vector<8x256xf32>,
    %c4_55 = arith.constant 4 : index
    %c0_56 = arith.constant 0 : index
    %82 = vector.load %arg2[%c4_55, %c0_56] : memref<9x256xf32, #tpu.memory_space<vmem>>, vector<1x256xf32>
    %83 = vector.broadcast %82 : vector<1x256xf32> to vector<8x256xf32>
    %84 = arith.mulf %58, %83 : vector<8x256xf32>
    %c104 = arith.constant 104 : index
    %c0_57 = arith.constant 0 : index
    %85 = vector.load %arg14[%c104, %c0_57] : memref<216x256xf32, #tpu.memory_space<vmem>>, vector<8x256xf32>
    tpu.vector_store %arg14[%c104, %c0_57], %84 {strides = array<i32>} : memref<216x256xf32, #tpu.memory_space<vmem>>, vector<8x256xf32>,
    %c255_i32_58 = arith.constant 255 : i32
    %86 = tpu.dynamic_rotate %58 by %c255_i32_58 dim 1 : vector<8x256xf32>, i32 -> vector<8x256xf32>
    %c5_59 = arith.constant 5 : index
    %c0_60 = arith.constant 0 : index
    %87 = vector.load %arg2[%c5_59, %c0_60] : memref<9x256xf32, #tpu.memory_space<vmem>>, vector<1x256xf32>
    %88 = vector.broadcast %87 : vector<1x256xf32> to vector<8x256xf32>
    %89 = arith.mulf %86, %88 : vector<8x256xf32>
    %c128 = arith.constant 128 : index
    %c0_61 = arith.constant 0 : index
    %90 = vector.load %arg14[%c128, %c0_61] : memref<216x256xf32, #tpu.memory_space<vmem>>, vector<8x256xf32>
    tpu.vector_store %arg14[%c128, %c0_61], %89 {strides = array<i32>} : memref<216x256xf32, #tpu.memory_space<vmem>>, vector<8x256xf32>,
    %c241_i32_62 = arith.constant 241 : i32
    %91 = tpu.dynamic_rotate %58 by %c241_i32_62 dim 1 : vector<8x256xf32>, i32 -> vector<8x256xf32>
    %c6_63 = arith.constant 6 : index
    %c0_64 = arith.constant 0 : index
    %92 = vector.load %arg2[%c6_63, %c0_64] : memref<9x256xf32, #tpu.memory_space<vmem>>, vector<1x256xf32>
    %93 = vector.broadcast %92 : vector<1x256xf32> to vector<8x256xf32>
    %94 = arith.mulf %91, %93 : vector<8x256xf32>
    %c152 = arith.constant 152 : index
    %c0_65 = arith.constant 0 : index
    %95 = vector.load %arg14[%c152, %c0_65] : memref<216x256xf32, #tpu.memory_space<vmem>>, vector<8x256xf32>
    tpu.vector_store %arg14[%c152, %c0_65], %94 {strides = array<i32>} : memref<216x256xf32, #tpu.memory_space<vmem>>, vector<8x256xf32>,
    %c240_i32_66 = arith.constant 240 : i32
    %96 = tpu.dynamic_rotate %58 by %c240_i32_66 dim 1 : vector<8x256xf32>, i32 -> vector<8x256xf32>
    %c7_67 = arith.constant 7 : index
    %c0_68 = arith.constant 0 : index
    %97 = vector.load %arg2[%c7_67, %c0_68] : memref<9x256xf32, #tpu.memory_space<vmem>>, vector<1x256xf32>
    %98 = vector.broadcast %97 : vector<1x256xf32> to vector<8x256xf32>
    %99 = arith.mulf %96, %98 : vector<8x256xf32>
    %c176 = arith.constant 176 : index
    %c0_69 = arith.constant 0 : index
    %100 = vector.load %arg14[%c176, %c0_69] : memref<216x256xf32, #tpu.memory_space<vmem>>, vector<8x256xf32>
    tpu.vector_store %arg14[%c176, %c0_69], %99 {strides = array<i32>} : memref<216x256xf32, #tpu.memory_space<vmem>>, vector<8x256xf32>,
    %c239_i32_70 = arith.constant 239 : i32
    %101 = tpu.dynamic_rotate %58 by %c239_i32_70 dim 1 : vector<8x256xf32>, i32 -> vector<8x256xf32>
    %c8_71 = arith.constant 8 : index
    %c0_72 = arith.constant 0 : index
    %102 = vector.load %arg2[%c8_71, %c0_72] : memref<9x256xf32, #tpu.memory_space<vmem>>, vector<1x256xf32>
    %103 = vector.broadcast %102 : vector<1x256xf32> to vector<8x256xf32>
    %104 = arith.mulf %101, %103 : vector<8x256xf32>
    %c200 = arith.constant 200 : index
    %c0_73 = arith.constant 0 : index
    %105 = vector.load %arg14[%c200, %c0_73] : memref<216x256xf32, #tpu.memory_space<vmem>>, vector<8x256xf32>
    tpu.vector_store %arg14[%c200, %c0_73], %104 {strides = array<i32>} : memref<216x256xf32, #tpu.memory_space<vmem>>, vector<8x256xf32>,
    %c0_74 = arith.constant 0 : index
    %c0_75 = arith.constant 0 : index
    %106 = vector.load %arg7[%c0_74, %c0_75] : memref<8x1xf32, #tpu.memory_space<vmem>>, vector<8x1xf32>
    %107 = vector.shape_cast %106 : vector<8x1xf32> to vector<8x1xf32>
    %108 = vector.broadcast %107 : vector<8x1xf32> to vector<8x256xf32>
    %c0_76 = arith.constant 0 : index
    %c0_77 = arith.constant 0 : index
    %109 = vector.load %arg4[%c0_76, %c0_77] : memref<8x216xf32, #tpu.memory_space<vmem>>, vector<8x216xf32>
    %c0_78 = arith.constant 0 : index
    %c0_79 = arith.constant 0 : index
    %110 = vector.load %arg14[%c0_78, %c0_79] : memref<216x256xf32, #tpu.memory_space<vmem>>, vector<216x256xf32>
    %cst_80 = arith.constant dense<0.000000e+00> : vector<8x256xf32>
    %111 = tpu.matmul %109, %110, %cst_80 {dimension_numbers = #tpu.dot_dimension_numbers<[1], [0], [0], [1], [0, 0, 1, 1], [], []>} : vector<8x216xf32>, vector<216x256xf32>, vector<8x256xf32> -> vector<8x256xf32>
    %112 = arith.addf %108, %111 : vector<8x256xf32>
    %cst_81 = arith.constant 0.000000e+00 : f32
    %113 = vector.broadcast %cst_81 : f32 to vector<8x256xf32>
    %114 = arith.maximumf %112, %113 : vector<8x256xf32>
    %c0_82 = arith.constant 0 : index
    %c0_83 = arith.constant 0 : index
    %115 = vector.load %arg11[%c0_82, %c0_83] : memref<4x8xf32, #tpu.memory_space<vmem>>, vector<4x8xf32>
    %cst_84 = arith.constant dense<0.000000e+00> : vector<4x256xf32>
    %116 = tpu.matmul %115, %114, %cst_84 {dimension_numbers = #tpu.dot_dimension_numbers<[1], [0], [0], [1], [0, 0, 1, 1], [], []>} : vector<4x8xf32>, vector<8x256xf32>, vector<4x256xf32> -> vector<4x256xf32>
    %117 = arith.addf %61, %116 : vector<4x256xf32>
    %c17_i32_85 = arith.constant 17 : i32
    %118 = tpu.dynamic_rotate %114 by %c17_i32_85 dim 1 : vector<8x256xf32>, i32 -> vector<8x256xf32>
    %c0_86 = arith.constant 0 : index
    %c0_87 = arith.constant 0 : index
    %119 = vector.load %arg2[%c0_86, %c0_87] : memref<9x256xf32, #tpu.memory_space<vmem>>, vector<1x256xf32>
    %120 = vector.broadcast %119 : vector<1x256xf32> to vector<8x256xf32>
    %121 = arith.mulf %118, %120 : vector<8x256xf32>
    %c16 = arith.constant 16 : index
    %c0_88 = arith.constant 0 : index
    %122 = vector.load %arg14[%c16, %c0_88] : memref<216x256xf32, #tpu.memory_space<vmem>>, vector<8x256xf32>
    tpu.vector_store %arg14[%c16, %c0_88], %121 {strides = array<i32>} : memref<216x256xf32, #tpu.memory_space<vmem>>, vector<8x256xf32>,
    %c16_i32_89 = arith.constant 16 : i32
    %123 = tpu.dynamic_rotate %114 by %c16_i32_89 dim 1 : vector<8x256xf32>, i32 -> vector<8x256xf32>
    %c1_90 = arith.constant 1 : index
    %c0_91 = arith.constant 0 : index
    %124 = vector.load %arg2[%c1_90, %c0_91] : memref<9x256xf32, #tpu.memory_space<vmem>>, vector<1x256xf32>
    %125 = vector.broadcast %124 : vector<1x256xf32> to vector<8x256xf32>
    %126 = arith.mulf %123, %125 : vector<8x256xf32>
    %c40 = arith.constant 40 : index
    %c0_92 = arith.constant 0 : index
    %127 = vector.load %arg14[%c40, %c0_92] : memref<216x256xf32, #tpu.memory_space<vmem>>, vector<8x256xf32>
    tpu.vector_store %arg14[%c40, %c0_92], %126 {strides = array<i32>} : memref<216x256xf32, #tpu.memory_space<vmem>>, vector<8x256xf32>,
    %c15_i32_93 = arith.constant 15 : i32
    %128 = tpu.dynamic_rotate %114 by %c15_i32_93 dim 1 : vector<8x256xf32>, i32 -> vector<8x256xf32>
    %c2_94 = arith.constant 2 : index
    %c0_95 = arith.constant 0 : index
    %129 = vector.load %arg2[%c2_94, %c0_95] : memref<9x256xf32, #tpu.memory_space<vmem>>, vector<1x256xf32>
    %130 = vector.broadcast %129 : vector<1x256xf32> to vector<8x256xf32>
    %131 = arith.mulf %128, %130 : vector<8x256xf32>
    %c64 = arith.constant 64 : index
    %c0_96 = arith.constant 0 : index
    %132 = vector.load %arg14[%c64, %c0_96] : memref<216x256xf32, #tpu.memory_space<vmem>>, vector<8x256xf32>
    tpu.vector_store %arg14[%c64, %c0_96], %131 {strides = array<i32>} : memref<216x256xf32, #tpu.memory_space<vmem>>, vector<8x256xf32>,
    %c1_i32_97 = arith.constant 1 : i32
    %133 = tpu.dynamic_rotate %114 by %c1_i32_97 dim 1 : vector<8x256xf32>, i32 -> vector<8x256xf32>
    %c3_98 = arith.constant 3 : index
    %c0_99 = arith.constant 0 : index
    %134 = vector.load %arg2[%c3_98, %c0_99] : memref<9x256xf32, #tpu.memory_space<vmem>>, vector<1x256xf32>
    %135 = vector.broadcast %134 : vector<1x256xf32> to vector<8x256xf32>
    %136 = arith.mulf %133, %135 : vector<8x256xf32>
    %c88 = arith.constant 88 : index
    %c0_100 = arith.constant 0 : index
    %137 = vector.load %arg14[%c88, %c0_100] : memref<216x256xf32, #tpu.memory_space<vmem>>, vector<8x256xf32>
    tpu.vector_store %arg14[%c88, %c0_100], %136 {strides = array<i32>} : memref<216x256xf32, #tpu.memory_space<vmem>>, vector<8x256xf32>,
    %c4_101 = arith.constant 4 : index
    %c0_102 = arith.constant 0 : index
    %138 = vector.load %arg2[%c4_101, %c0_102] : memref<9x256xf32, #tpu.memory_space<vmem>>, vector<1x256xf32>
    %139 = vector.broadcast %138 : vector<1x256xf32> to vector<8x256xf32>
    %140 = arith.mulf %114, %139 : vector<8x256xf32>
    %c112 = arith.constant 112 : index
    %c0_103 = arith.constant 0 : index
    %141 = vector.load %arg14[%c112, %c0_103] : memref<216x256xf32, #tpu.memory_space<vmem>>, vector<8x256xf32>
    tpu.vector_store %arg14[%c112, %c0_103], %140 {strides = array<i32>} : memref<216x256xf32, #tpu.memory_space<vmem>>, vector<8x256xf32>,
    %c255_i32_104 = arith.constant 255 : i32
    %142 = tpu.dynamic_rotate %114 by %c255_i32_104 dim 1 : vector<8x256xf32>, i32 -> vector<8x256xf32>
    %c5_105 = arith.constant 5 : index
    %c0_106 = arith.constant 0 : index
    %143 = vector.load %arg2[%c5_105, %c0_106] : memref<9x256xf32, #tpu.memory_space<vmem>>, vector<1x256xf32>
    %144 = vector.broadcast %143 : vector<1x256xf32> to vector<8x256xf32>
    %145 = arith.mulf %142, %144 : vector<8x256xf32>
    %c136 = arith.constant 136 : index
    %c0_107 = arith.constant 0 : index
    %146 = vector.load %arg14[%c136, %c0_107] : memref<216x256xf32, #tpu.memory_space<vmem>>, vector<8x256xf32>
    tpu.vector_store %arg14[%c136, %c0_107], %145 {strides = array<i32>} : memref<216x256xf32, #tpu.memory_space<vmem>>, vector<8x256xf32>,
    %c241_i32_108 = arith.constant 241 : i32
    %147 = tpu.dynamic_rotate %114 by %c241_i32_108 dim 1 : vector<8x256xf32>, i32 -> vector<8x256xf32>
    %c6_109 = arith.constant 6 : index
    %c0_110 = arith.constant 0 : index
    %148 = vector.load %arg2[%c6_109, %c0_110] : memref<9x256xf32, #tpu.memory_space<vmem>>, vector<1x256xf32>
    %149 = vector.broadcast %148 : vector<1x256xf32> to vector<8x256xf32>
    %150 = arith.mulf %147, %149 : vector<8x256xf32>
    %c160 = arith.constant 160 : index
    %c0_111 = arith.constant 0 : index
    %151 = vector.load %arg14[%c160, %c0_111] : memref<216x256xf32, #tpu.memory_space<vmem>>, vector<8x256xf32>
    tpu.vector_store %arg14[%c160, %c0_111], %150 {strides = array<i32>} : memref<216x256xf32, #tpu.memory_space<vmem>>, vector<8x256xf32>,
    %c240_i32_112 = arith.constant 240 : i32
    %152 = tpu.dynamic_rotate %114 by %c240_i32_112 dim 1 : vector<8x256xf32>, i32 -> vector<8x256xf32>
    %c7_113 = arith.constant 7 : index
    %c0_114 = arith.constant 0 : index
    %153 = vector.load %arg2[%c7_113, %c0_114] : memref<9x256xf32, #tpu.memory_space<vmem>>, vector<1x256xf32>
    %154 = vector.broadcast %153 : vector<1x256xf32> to vector<8x256xf32>
    %155 = arith.mulf %152, %154 : vector<8x256xf32>
    %c184 = arith.constant 184 : index
    %c0_115 = arith.constant 0 : index
    %156 = vector.load %arg14[%c184, %c0_115] : memref<216x256xf32, #tpu.memory_space<vmem>>, vector<8x256xf32>
    tpu.vector_store %arg14[%c184, %c0_115], %155 {strides = array<i32>} : memref<216x256xf32, #tpu.memory_space<vmem>>, vector<8x256xf32>,
    %c239_i32_116 = arith.constant 239 : i32
    %157 = tpu.dynamic_rotate %114 by %c239_i32_116 dim 1 : vector<8x256xf32>, i32 -> vector<8x256xf32>
    %c8_117 = arith.constant 8 : index
    %c0_118 = arith.constant 0 : index
    %158 = vector.load %arg2[%c8_117, %c0_118] : memref<9x256xf32, #tpu.memory_space<vmem>>, vector<1x256xf32>
    %159 = vector.broadcast %158 : vector<1x256xf32> to vector<8x256xf32>
    %160 = arith.mulf %157, %159 : vector<8x256xf32>
    %c208 = arith.constant 208 : index
    %c0_119 = arith.constant 0 : index
    %161 = vector.load %arg14[%c208, %c0_119] : memref<216x256xf32, #tpu.memory_space<vmem>>, vector<8x256xf32>
    tpu.vector_store %arg14[%c208, %c0_119], %160 {strides = array<i32>} : memref<216x256xf32, #tpu.memory_space<vmem>>, vector<8x256xf32>,
    %c0_120 = arith.constant 0 : index
    %c0_121 = arith.constant 0 : index
    %162 = vector.load %arg8[%c0_120, %c0_121] : memref<8x1xf32, #tpu.memory_space<vmem>>, vector<8x1xf32>
    %163 = vector.shape_cast %162 : vector<8x1xf32> to vector<8x1xf32>
    %164 = vector.broadcast %163 : vector<8x1xf32> to vector<8x256xf32>
    %c0_122 = arith.constant 0 : index
    %c0_123 = arith.constant 0 : index
    %165 = vector.load %arg5[%c0_122, %c0_123] : memref<8x216xf32, #tpu.memory_space<vmem>>, vector<8x216xf32>
    %c0_124 = arith.constant 0 : index
    %c0_125 = arith.constant 0 : index
    %166 = vector.load %arg14[%c0_124, %c0_125] : memref<216x256xf32, #tpu.memory_space<vmem>>, vector<216x256xf32>
    %cst_126 = arith.constant dense<0.000000e+00> : vector<8x256xf32>
    %167 = tpu.matmul %165, %166, %cst_126 {dimension_numbers = #tpu.dot_dimension_numbers<[1], [0], [0], [1], [0, 0, 1, 1], [], []>} : vector<8x216xf32>, vector<216x256xf32>, vector<8x256xf32> -> vector<8x256xf32>
    %168 = arith.addf %164, %167 : vector<8x256xf32>
    %cst_127 = arith.constant 0.000000e+00 : f32
    %169 = vector.broadcast %cst_127 : f32 to vector<8x256xf32>
    %170 = arith.maximumf %168, %169 : vector<8x256xf32>
    %c0_128 = arith.constant 0 : index
    %c0_129 = arith.constant 0 : index
    %171 = vector.load %arg12[%c0_128, %c0_129] : memref<4x8xf32, #tpu.memory_space<vmem>>, vector<4x8xf32>
    %cst_130 = arith.constant dense<0.000000e+00> : vector<4x256xf32>
    %172 = tpu.matmul %171, %170, %cst_130 {dimension_numbers = #tpu.dot_dimension_numbers<[1], [0], [0], [1], [0, 0, 1, 1], [], []>} : vector<4x8xf32>, vector<8x256xf32>, vector<4x256xf32> -> vector<4x256xf32>
    %173 = arith.addf %117, %172 : vector<4x256xf32>
    %c0_131 = arith.constant 0 : index
    %c0_132 = arith.constant 0 : index
    %c0_133 = arith.constant 0 : index
    %174 = vector.load %arg13[%c0_131, %c0_132, %c0_133] : memref<1x4x256xf32, #tpu.memory_space<vmem>>, vector<1x4x256xf32>
    %175 = vector.shape_cast %174 : vector<1x4x256xf32> to vector<4x256xf32>
    %176 = vector.shape_cast %173 : vector<4x256xf32> to vector<1x4x256xf32>
    tpu.vector_store %arg13[%c0_131, %c0_132, %c0_133], %176 {strides = array<i32>} : memref<1x4x256xf32, #tpu.memory_space<vmem>>, vector<1x4x256xf32>,
    return
  }
  func.func @transform_0(%arg0: i32) -> (i32, i32, i32) {
    %c0_i32 = arith.constant 0 : i32
    %c0_i32_0 = arith.constant 0 : i32
    %c0_i32_1 = arith.constant 0 : i32
    return %arg0, %c0_i32, %c0_i32_0 : i32, i32, i32
  }
  func.func @transform_1(%arg0: i32) -> (i32, i32) {
    %c0_i32 = arith.constant 0 : i32
    %c0_i32_0 = arith.constant 0 : i32
    %c0_i32_1 = arith.constant 0 : i32
    return %c0_i32, %c0_i32_0 : i32, i32
  }
  func.func @transform_2(%arg0: i32) -> (i32, i32) {
    %c0_i32 = arith.constant 0 : i32
    %c0_i32_0 = arith.constant 0 : i32
    %c0_i32_1 = arith.constant 0 : i32
    return %c0_i32, %c0_i32_0 : i32, i32
  }
  func.func @transform_3(%arg0: i32) -> (i32, i32) {
    %c0_i32 = arith.constant 0 : i32
    %c0_i32_0 = arith.constant 0 : i32
    %c0_i32_1 = arith.constant 0 : i32
    return %c0_i32, %c0_i32_0 : i32, i32
  }
  func.func @transform_4(%arg0: i32) -> (i32, i32) {
    %c0_i32 = arith.constant 0 : i32
    %c0_i32_0 = arith.constant 0 : i32
    %c0_i32_1 = arith.constant 0 : i32
    return %c0_i32, %c0_i32_0 : i32, i32
  }
  func.func @transform_5(%arg0: i32) -> (i32, i32) {
    %c0_i32 = arith.constant 0 : i32
    %c0_i32_0 = arith.constant 0 : i32
    %c0_i32_1 = arith.constant 0 : i32
    return %c0_i32, %c0_i32_0 : i32, i32
  }
  func.func @transform_6(%arg0: i32) -> (i32, i32) {
    %c0_i32 = arith.constant 0 : i32
    %c0_i32_0 = arith.constant 0 : i32
    %c0_i32_1 = arith.constant 0 : i32
    return %c0_i32, %c0_i32_0 : i32, i32
  }
  func.func @transform_7(%arg0: i32) -> (i32, i32) {
    %c0_i32 = arith.constant 0 : i32
    %c0_i32_0 = arith.constant 0 : i32
    %c0_i32_1 = arith.constant 0 : i32
    return %c0_i32, %c0_i32_0 : i32, i32
  }
  func.func @transform_8(%arg0: i32) -> (i32, i32) {
    %c0_i32 = arith.constant 0 : i32
    %c0_i32_0 = arith.constant 0 : i32
    %c0_i32_1 = arith.constant 0 : i32
    return %c0_i32, %c0_i32_0 : i32, i32
  }
  func.func @transform_9(%arg0: i32) -> (i32, i32) {
    %c0_i32 = arith.constant 0 : i32
    %c0_i32_0 = arith.constant 0 : i32
    %c0_i32_1 = arith.constant 0 : i32
    return %c0_i32, %c0_i32_0 : i32, i32
  }
  func.func @transform_10(%arg0: i32) -> (i32, i32) {
    %c0_i32 = arith.constant 0 : i32
    %c0_i32_0 = arith.constant 0 : i32
    %c0_i32_1 = arith.constant 0 : i32
    return %c0_i32, %c0_i32_0 : i32, i32
  }
  func.func @transform_11(%arg0: i32) -> (i32, i32) {
    %c0_i32 = arith.constant 0 : i32
    %c0_i32_0 = arith.constant 0 : i32
    %c0_i32_1 = arith.constant 0 : i32
    return %c0_i32, %c0_i32_0 : i32, i32
  }
  func.func @transform_12(%arg0: i32) -> (i32, i32, i32) {
    %c0_i32 = arith.constant 0 : i32
    %c0_i32_0 = arith.constant 0 : i32
    %c0_i32_1 = arith.constant 0 : i32
    return %arg0, %c0_i32, %c0_i32_0 : i32, i32, i32
  }
}

</mosaic_0001>

<bundles_post_ra>
// kernel: rdb_forward.1
= control target key start
LH: loop header
LB: loop body
LE: loop exit
PB: predicated region body
PF: predicated region fallthrough
CT: control target
= control target key end

     0   :  { %s2173_s21 = smov 0   ;;  %s2806_s0 = inlined_call_operand.vmem [shape: f32[2,4,256], index: 0, kind: input, shape index: {}]   ;;  %s2807_s1 = inlined_call_operand.vmem [shape: f32[9,256], index: 1, kind: input, shape index: {}]   ;;  %s2808_s2 = inlined_call_operand.vmem [shape: f32[8,216], index: 2, kind: input, shape index: {}]   ;;  %s2809_s3 = inlined_call_operand.vmem [shape: f32[8,216], index: 3, kind: input, shape index: {}]   ;;  %s2810_s4 = inlined_call_operand.vmem [shape: f32[8,216], index: 4, kind: input, shape index: {}]   ;;  %s2811_s5 = inlined_call_operand.vmem [shape: f32[8,1], index: 5, kind: input, shape index: {}]   ;;  %s2812_s6 = inlined_call_operand.vmem [shape: f32[8,1], index: 6, kind: input, shape index: {}]   ;;  %s2813_s7 = inlined_call_operand.vmem [shape: f32[8,1], index: 7, kind: input, shape index: {}]   ;;  %s2814_s8 = inlined_call_operand.vmem [shape: f32[4,4], index: 8, kind: input, shape index: {}]   ;;  %s2815_s9 = inlined_call_operand.vmem [shape: f32[4,8], index: 9, kind: input, shape index: {}]   ;;  %s2816_s10 = inlined_call_operand.vmem [shape: f32[4,8], index: 10, kind: input, shape index: {}]   ;;  %s2817_s11 = inlined_call_operand.vmem [shape: f32[4,8], index: 11, kind: input, shape index: {}]   ;;  %s2818_s12 = inlined_call_operand.vmem [shape: f32[2,4,256], index: 12, kind: output, shape index: {}]  }
   0x1 LB: > { %s1860_s22 = sadd.s32 4294967295, %s2095_s21   ;;  %p1864_p0 = scmp.ge.s32.totalorder %s2095_s21, 1  ;;  %s2095_s21 = sphi %s2173_s21, %s22_s21  }
   0x2   : > { %p362_p1 = scmp.lt.s32.totalorder %s2095_s21, 3 }
   0x4   : > { %p363_p2 = pnand %p1864_p0, %p362_p1 }
   0x5   : > { %p2181_p3 = scmp.lt.s32.totalorder (!%p363_p2), %s1860_s22, 1  ;;  %v2097_v0 = vmov (!%p363_p2), 0.0   ;;  %s2098_s28 = smov (!%p363_p2), 16   ;;  %v477_v3 = vlaneseq (!%p363_p2)  ;;  %v1872_v7 = vld [vmem:[%s2807_s1 + $0x4] ss:$8 sm:$0x3] (!%p363_p2) }
   0x6   : > { %366 = sbr.rel (%p363_p2) target bundleno = 1420 (0x58c), region = 68  ;;  %420 = vst [vmem:[#allocation2 + $0x30] sm:$0xff] (!%p363_p2), %v2097_v0  ;;  %421 = vst [vmem:[#allocation2 + $0x38] sm:$0xff] (!%p363_p2), %v2097_v0  ;;  %895 = vmatprep.mubr.f32.mxu1 (!%p363_p2), %v2097_v0  ;;  %s2099_s29 = smov (!%p363_p2), 17   ;;  %v692_v13 = vld [vmem:[%s2808_s2 + $0x8] sm:$0xff] (!%p363_p2)  ;;  %vm747_vm0 = vcmask (!%p363_p2), 719872  }
   0x7   : > { %414 = vst [vmem:[#allocation2] sm:$0xff] (!%p363_p2), %v2097_v0  ;;  %415 = vst [vmem:[#allocation2 + $0x8] sm:$0xff] (!%p363_p2), %v2097_v0  ;;  %v485_v4 = vshrl.u32 (!%p363_p2), %v477_v3, 7  ;;  %s2100_s30 = smov (!%p363_p2), 15   ;;  %s2101_s15 = smov (!%p363_p2), 1   ;;  %1877 = vmatprep.mubr.msk.f32.mxu0 (!%p363_p2), %vm747_vm0, %v692_v13  ;;  %v685_v14 = vld [vmem:[%s2811_s5] sm:$0xff] (!%p363_p2) }
   0x8   : > { %426 = vst [vmem:[#allocation2 + $0x60] sm:$0xff] (!%p363_p2), %v2097_v0  ;;  %427 = vst [vmem:[#allocation2 + $0x68] sm:$0xff] (!%p363_p2), %v2097_v0  ;;  %s2102_s16 = smov (!%p363_p2), 127   ;;  %s2103_s17 = smov (!%p363_p2), 113   ;;  %v2106_v15 = vmov (!%p363_p2), 0   ;;  %v2269_v16 = vand.u32 (!%p363_p2), 127, %v477_v3 }
   0x9   : > { %432 = vst [vmem:[#allocation2 + $0x90] sm:$0xff] (!%p363_p2), %v2097_v0  ;;  %433 = vst [vmem:[#allocation2 + $0x98] sm:$0xff] (!%p363_p2), %v2097_v0  ;;  %v2232_v5 = vsub.s32 (!%p363_p2), 0, %v485_v4  ;;  %v2234_v6 = vsub.s32 (!%p363_p2), 1, %v485_v4  ;;  %s2104_s18 = smov (!%p363_p2), 112   ;;  %s2105_s19 = smov (!%p363_p2), 111   ;;  %2086 = vset.pattern.permute.xlu0 (!%p363_p2), %v2106_v15  ;;  %2087 = vset.pattern.permute.xlu1 (!%p363_p2), %v2106_v15 }
   0xa   : > { %438 = vst [vmem:[#allocation2 + $0xc0] sm:$0xff] (!%p363_p2), %v2097_v0  ;;  %439 = vst [vmem:[#allocation2 + $0xc8] sm:$0xff] (!%p363_p2), %v2097_v0  ;;  %v1869_v17 = vld [vmem:[%s2807_s1 + $0x1] ss:$8 sm:$0x3] (!%p363_p2)  ;;  %vm502_vm1 = vcmp.lt.s32.totalorder (!%p363_p2), %v2269_v16, 16 }
   0xb   : > { %444 = vst [vmem:[#allocation2 + $0xf0] sm:$0xff] (!%p363_p2), %v2097_v0  ;;  %445 = vst [vmem:[#allocation2 + $0xf8] sm:$0xff] (!%p363_p2), %v2097_v0  ;;  %v576_v8 = vrot.slane (!%p363_p2), %v1872_v7, %v2232_v5  ;;  %v580_v9 = vrot.slane (!%p363_p2), %v1872_v7, %v2234_v6  ;;  %v482_v18 = vld [vmem:[%s2807_s1] ss:$8 sm:$0x3] (!%p363_p2)  ;;  %vm479_vm2 = vcmp.lt.s32.totalorder (!%p363_p2), %v2269_v16, 17  ;;  %v511_v22 = vrot.slane (!%p363_p2), %v1869_v17, %v2232_v5 }
   0xc   : > { %450 = vst [vmem:[#allocation2 + $0x120] sm:$0xff] (!%p363_p2), %v2097_v0  ;;  %451 = vst [vmem:[#allocation2 + $0x128] sm:$0xff] (!%p363_p2), %v2097_v0  ;;  %v1870_v21 = vld [vmem:[%s2807_s1 + $0x2] ss:$8 sm:$0x3] (!%p363_p2)  ;;  %v515_v23 = vrot.slane (!%p363_p2), %v1869_v17, %v2234_v6  ;;  %v487_v24 = vrot.slane (!%p363_p2), %v482_v18, %v2232_v5  ;;  %v491_v25 = vrot.slane (!%p363_p2), %v482_v18, %v2234_v6  ;;  %vm526_vm3 = vcmp.lt.s32.totalorder (!%p363_p2), %v2269_v16, 15 }
   0xd   : > { %456 = vst [vmem:[#allocation2 + $0x150] sm:$0xff] %v2097_v0  ;;  %457 = vst [vmem:[#allocation2 + $0x158] sm:$0xff] %v2097_v0  ;;  %s2821_s22 = smov (!%p2181_p3, %s1860_s22), 1  ;;  %v581_v10 = vcombine.low %v576_v8, %v580_v9  ;;  %v535_v28 = vrot.slane %v1870_v21, %v2232_v5  ;;  %v539_v29 = vrot.slane %v1870_v21, %v2234_v6  ;;  %v1871_v38 = vld [vmem:[%s2807_s1 + $0x3] ss:$8 sm:$0x3] }
   0xe   : > { %462 = vst [vmem:[#allocation2 + $0x180] sm:$0xff] %v2097_v0  ;;  %463 = vst [vmem:[#allocation2 + $0x188] sm:$0xff] %v2097_v0  ;;  %s1904_s24 = sshll.u32 %s2821_s22, 3  ;;  %vm550_vm4 = vcmp.lt.s32.totalorder %v2269_v16, 1  ;;  %v559_v45 = vrot.slane %v1871_v38, %v2232_v5  ;;  %v563_v46 = vrot.slane %v1871_v38, %v2234_v6  ;;  %vm593_vm5 = vcmp.lt.s32.totalorder %v2269_v16, 127 }
   0xf   : > { %s408_s27 = scalar_lea.vmem %s2806_s0, %s1904_s24  ;;  %v1873_v47 = vld [vmem:[%s2807_s1 + $0x5] ss:$8 sm:$0x3]  ;;  %v1874_v56 = vld [vmem:[%s2807_s1 + $0x6] ss:$8 sm:$0x3]  ;;  %s413_s23 = scalar_lea.vmem %s2818_s12, %s1904_s24 }
  0x10   : > { %v2214_v1 = vld [vmem:[%s408_s27] sm:$0xff]  ;;  %v602_v54 = vrot.slane %v1873_v47, %v2232_v5  ;;  %v606_v55 = vrot.slane %v1873_v47, %v2234_v6  ;;  %vm617_vm6 = vcmp.lt.s32.totalorder %v2269_v16, 113  ;;  %v626_v7 = vrot.slane %v1874_v56, %v2232_v5 }
  0x11   : > { %498 = vrot.lane.b32.xlu1 %v2214_v1, %s2098_s28  ;;  %473 = vrot.lane.b32.xlu0 %v2214_v1, %s2099_s29  ;;  %v2222_v2 = vcombine.high %v2214_v1, %v2214_v1  ;;  %v583_v11 = vmul.f32 %v581_v10, %v2214_v1  ;;  %v1875_v13 = vld [vmem:[%s2807_s1 + $0x7] ss:$8 sm:$0x3]  ;;  %vm641_vm7 = vcmp.lt.s32.totalorder %v2269_v16, 112  ;;  %vm665_vm8 = vcmp.lt.s32.totalorder %v2269_v16, 111 }
  0x12   : > { %vm827_vm9 = vcmask 64512   ;;  %vm906_vm10 = vcmask 1043456   ;;  %vm902_vm11 = vcmask 31744  }
  0x13   : > { %v585_v12 = vcombine.high %v583_v11, %v583_v11  ;;  %587 = vst [vmem:[#allocation2 + $0xc0] sm:$0xf] %v583_v11 }
  0x15   : > { %500 = vrot.lane.b32.xlu1 %v2222_v2, %s2098_s28  ;;  %475 = vrot.lane.b32.xlu0 %v2222_v2, %s2099_s29  ;;  %588 = vst [vmem:[#allocation2 + $0xc8] sm:$0xf] %v585_v12  ;;  %v630_v12 = vrot.slane %v1874_v56, %v2234_v6 }
  0x19   : > { %524 = vrot.lane.b32.xlu1 %v2222_v2, %s2100_s30  ;;  %522 = vrot.lane.b32.xlu0 %v2214_v1, %s2100_s30 }
  0x1d   : > { %548 = vrot.lane.b32.xlu1 %v2222_v2, %s2101_s15  ;;  %546 = vrot.lane.b32.xlu0 %v2214_v1, %s2101_s15 }
  0x21   : > { %591 = vrot.lane.b32.xlu1 %v2222_v2, %s2102_s16  ;;  %589 = vrot.lane.b32.xlu0 %v2214_v1, %s2102_s16 }
  0x25   : > { %615 = vrot.lane.b32.xlu1 %v2222_v2, %s2103_s17  ;;  %613 = vrot.lane.b32.xlu0 %v2214_v1, %s2103_s17 }
  0x29   : > { %639 = vrot.lane.b32.xlu1 %v2222_v2, %s2104_s18  ;;  %637 = vrot.lane.b32.xlu0 %v2214_v1, %s2104_s18 }
  0x2d   : > { %663 = vrot.lane.b32.xlu1 %v2222_v2, %s2105_s19  ;;  %661 = vrot.lane.b32.xlu0 %v2214_v1, %s2105_s19 }
  0x31   : > { %688 = vperm.xlu0 %2086, %v685_v14  }
  0x83   : > { %v499_v19 = vpop.permute.xlu1 %498  ;;  %v474_v20 = vpop.permute.xlu0 %473 }
  0x87   : > { %v501_v26 = vpop.permute.xlu1 %500  ;;  %v476_v27 = vpop.permute.xlu0 %475 }
  0x88   : > { %v503_v30 = vsel %vm502_vm1, %v499_v19, %v501_v26  ;;  %v504_v31 = vsel %vm502_vm1, %v501_v26, %v499_v19  ;;  %v480_v32 = vsel %vm479_vm2, %v474_v20, %v476_v27  ;;  %v481_v33 = vsel %vm479_vm2, %v476_v27, %v474_v20 }
  0x89   : > { %v518_v34 = vmul.f32 %v511_v22, %v504_v31  ;;  %v519_v35 = vmul.f32 %v515_v23, %v503_v30  ;;  %v494_v36 = vmul.f32 %v487_v24, %v481_v33  ;;  %v495_v37 = vmul.f32 %v491_v25, %v480_v32  ;;  %v1876_v25 = vld [vmem:[%s2807_s1 + $0x10] ss:$8 sm:$0x3] }
  0x8a   : > { %v650_v23 = vrot.slane %v1875_v13, %v2232_v5  ;;  %v654_v24 = vrot.slane %v1875_v13, %v2234_v6  ;;  %v2107_v26 = vmov 0.0|0.0  }
  0x8b   : > { %520 = vst [vmem:[#allocation2 + $0x30] sm:$0xf] %v518_v34  ;;  %521 = vst [vmem:[#allocation2 + $0x38] sm:$0xf] %v519_v35  ;;  %v525_v39 = vpop.permute.xlu1 %524  ;;  %v523_v40 = vpop.permute.xlu0 %522 }
  0x8c   : > { %496 = vst [vmem:[#allocation2] sm:$0xf] %v494_v36  ;;  %497 = vst [vmem:[#allocation2 + $0x8] sm:$0xf] %v495_v37  ;;  %v527_v41 = vsel %vm526_vm3, %v523_v40, %v525_v39  ;;  %v528_v42 = vsel %vm526_vm3, %v525_v39, %v523_v40  ;;  %v674_v36 = vrot.slane %v1876_v25, %v2232_v5 }
  0x8d   : > { %v542_v43 = vmul.f32 %v535_v28, %v528_v42  ;;  %v543_v44 = vmul.f32 %v539_v29, %v527_v41  ;;  %v678_v37 = vrot.slane %v1876_v25, %v2234_v6 }
  0x8f   : > { %544 = vst [vmem:[#allocation2 + $0x60] sm:$0xf] %v542_v43  ;;  %545 = vst [vmem:[#allocation2 + $0x68] sm:$0xf] %v543_v44  ;;  %v549_v48 = vpop.permute.xlu1 %548  ;;  %v547_v49 = vpop.permute.xlu0 %546 }
  0x90   : > { %v551_v50 = vsel %vm550_vm4, %v547_v49, %v549_v48  ;;  %v552_v51 = vsel %vm550_vm4, %v549_v48, %v547_v49  ;;  %v2396_v48 = vld [vmem:[#allocation2 + $0xc8] sm:$0xff] }
  0x91   : > { %v566_v52 = vmul.f32 %v559_v45, %v552_v51  ;;  %v567_v53 = vmul.f32 %v563_v46, %v551_v50  ;;  %v1930_v49 = vpack.c.bf16 %v2097_v0, %v2396_v48  ;;  %v2402_v50 = vld [vmem:[#allocation2 + $0xc0] sm:$0xff] }
  0x92   : > { %v2324_v59 = vld [vmem:[#allocation2 + $0x38] sm:$0xff]  ;;  %v2340_v9 = vld [vmem:[#allocation2 + $0x30] sm:$0xff] }
  0x93   : > { %v2320_v57 = vld [vmem:[#allocation2 + $0x8] sm:$0xff]  ;;  %v2322_v58 = vld [vmem:[#allocation2] sm:$0xff]  ;;  %568 = vst [vmem:[#allocation2 + $0x90] sm:$0xf] %v566_v52  ;;  %569 = vst [vmem:[#allocation2 + $0x98] sm:$0xf] %v567_v53  ;;  %v592_v62 = vpop.permute.xlu1 %591  ;;  %v590_v63 = vpop.permute.xlu0 %589  ;;  %v2338_v8 = vpack.c.bf16 %v2324_v59, %v2097_v0  ;;  %v2349_v17 = vpack.c.bf16 %v2340_v9, %v2097_v0  ;;  %v1932_v52 = vpack.c.bf16 %v2097_v0, %v2402_v50 }
  0x94   : > { %v1906_v60 = vpack.c.bf16 %v2097_v0, %v2320_v57  ;;  %v1908_v61 = vpack.c.bf16 %v2097_v0, %v2322_v58  ;;  %v594_v3 = vsel %vm593_vm5, %v590_v63, %v592_v62  ;;  %v595_v4 = vsel %vm593_vm5, %v592_v62, %v590_v63 }
  0x95   : > { %v609_v10 = vmul.f32 %v602_v54, %v594_v3  ;;  %v610_v11 = vmul.f32 %v606_v55, %v595_v4 }
  0x96   : > { %1907 = vmatprep.subr.bf16.mxu0 %v1906_v60  ;;  %v2351_v18 = vld [vmem:[#allocation2 + $0x68] sm:$0xff]  ;;  %v2367_v28 = vld [vmem:[#allocation2 + $0x60] sm:$0xff] }
  0x97   : > { %1909 = vmatpush1.bf16.msra.mxu0 %v1908_v61  ;;  %611 = vst [vmem:[#allocation2 + $0xf0] sm:$0xf] %v609_v10  ;;  %612 = vst [vmem:[#allocation2 + $0xf8] sm:$0xf] %v610_v11  ;;  %v616_v14 = vpop.permute.xlu1 %615  ;;  %v614_v15 = vpop.permute.xlu0 %613  ;;  %v1918_v27 = vpack.c.bf16 %v2097_v0, %v2351_v18  ;;  %v1920_v38 = vpack.c.bf16 %v2097_v0, %v2367_v28 }
  0x98   : > { %1911 = vmatprep.subr.bf16.mxu0 %v2338_v8  ;;  %v618_v19 = vsel %vm617_vm6, %v614_v15, %v616_v14  ;;  %v619_v20 = vsel %vm617_vm6, %v616_v14, %v614_v15  ;;  %v691_v14 = vld [vmem:[%s2808_s2] sm:$0xff] }
  0x99   : > { %v633_v21 = vmul.f32 %v626_v7, %v618_v19  ;;  %v634_v22 = vmul.f32 %v630_v12, %v619_v20  ;;  %v1885_v19 = vld [vmem:[%s2807_s1 + $0x4] ss:$8 sm:$0x3] }
  0x9a   : > { %v2369_v31 = vld [vmem:[#allocation2 + $0x98] sm:$0xff]  ;;  %v2385_v40 = vld [vmem:[#allocation2 + $0x90] sm:$0xff]  ;;  %v1079_v25 = vrot.slane %v1885_v19, %v2234_v6 }
  0x9b   : > { %1913 = vmatpush1.bf16.msra.mxu0 %v2349_v17  ;;  %635 = vst [vmem:[#allocation2 + $0x120] sm:$0xf] %v633_v21  ;;  %636 = vst [vmem:[#allocation2 + $0x128] sm:$0xf] %v634_v22  ;;  %v640_v29 = vpop.permute.xlu1 %639  ;;  %v638_v30 = vpop.permute.xlu0 %637  ;;  %v2383_v39 = vpack.c.bf16 %v2369_v31, %v2097_v0  ;;  %v2393_v47 = vpack.c.bf16 %v2385_v40, %v2097_v0 }
  0x9c   : > { %1915 = vmatprep.subr.bf16.mxu0 %v2107_v26  ;;  %v642_v32 = vsel %vm641_vm7, %v638_v30, %v640_v29  ;;  %v643_v33 = vsel %vm641_vm7, %v640_v29, %v638_v30  ;;  %v826_v29 = vld [vmem:[%s2815_s9] sm:$0xf] }
  0x9d   : > { %v657_v34 = vmul.f32 %v650_v23, %v642_v32  ;;  %v658_v35 = vmul.f32 %v654_v24, %v643_v33  ;;  %v1075_v23 = vrot.slane %v1885_v19, %v2232_v5  ;;  %v469_v33 = vld [vmem:[%s2814_s8] sm:$0xf] }
  0x9e   : > { %v2404_v51 = vld [vmem:[#allocation2 + $0xf8] sm:$0xff]  ;;  %v2413_v54 = vld [vmem:[#allocation2 + $0xf0] sm:$0xff] }
  0x9f   : > { %1917 = vmatpush1.bf16.msra.mxu0 %v2107_v26  ;;  %659 = vst [vmem:[#allocation2 + $0x150] sm:$0xf] %v657_v34  ;;  %660 = vst [vmem:[#allocation2 + $0x158] sm:$0xf] %v658_v35  ;;  %v664_v41 = vpop.permute.xlu1 %663  ;;  %v662_v42 = vpop.permute.xlu0 %661  ;;  %v2411_v53 = vpack.c.bf16 %v2404_v51, %v2097_v0  ;;  %v2417_v55 = vpack.c.bf16 %v2413_v54, %v2097_v0 }
  0xa0   : > { %1919 = vmatprep.subr.bf16.mxu0 %v1918_v27  ;;  %v666_v43 = vsel %vm665_vm8, %v662_v42, %v664_v41  ;;  %v667_v44 = vsel %vm665_vm8, %v664_v41, %v662_v42  ;;  %v988_v34 = vld [vmem:[%s2807_s1] ss:$8 sm:$0x3]  ;;  %v1882_v41 = vld [vmem:[%s2807_s1 + $0x1] ss:$8 sm:$0x3] }
  0xa1   : > { %v681_v45 = vmul.f32 %v674_v36, %v666_v43  ;;  %v682_v46 = vmul.f32 %v678_v37, %v667_v44  ;;  %v993_v37 = vrot.slane %v988_v34, %v2232_v5 }
  0xa2   : > { %v2420_v56 = vld [vmem:[#allocation2 + $0x128] sm:$0xff]  ;;  %v2426_v61 = vld [vmem:[#allocation2 + $0x120] sm:$0xff] }
  0xa3   : > { %1921 = vmatpush1.bf16.msra.mxu0 %v1920_v38  ;;  %683 = vst [vmem:[#allocation2 + $0x180] sm:$0xf] %v681_v45  ;;  %684 = vst [vmem:[#allocation2 + $0x188] sm:$0xf] %v682_v46  ;;  %v1942_v60 = vpack.c.bf16 %v2097_v0, %v2420_v56  ;;  %v1944_v63 = vpack.c.bf16 %v2097_v0, %v2426_v61  ;;  %v997_v38 = vrot.slane %v988_v34, %v2234_v6 }
  0xa4   : > { %1923 = vmatprep.subr.bf16.mxu0 %v2383_v39  ;;  %v1886_v34 = vld [vmem:[%s2807_s1 + $0x5] ss:$8 sm:$0x3] }
  0xa6   : > { %v2428_v62 = vld [vmem:[#allocation2 + $0x158] sm:$0xff]  ;;  %v2437_v4 = vld [vmem:[#allocation2 + $0x150] sm:$0xff] }
  0xa7   : > { %1925 = vmatpush1.bf16.msra.mxu0 %v2393_v47  ;;  %v2435_v3 = vpack.c.bf16 %v2428_v62, %v2097_v0  ;;  %v2441_v7 = vpack.c.bf16 %v2437_v4, %v2097_v0 }
  0xa8   : > { %1927 = vmatprep.subr.bf16.mxu0 %v2107_v26 }
  0xaa   : > { %v2444_v10 = vld [vmem:[#allocation2 + $0x188] sm:$0xff]  ;;  %v2450_v12 = vld [vmem:[#allocation2 + $0x180] sm:$0xff] }
  0xab   : > { %1929 = vmatpush1.bf16.msra.mxu0 %v2107_v26  ;;  %v1954_v11 = vpack.c.bf16 %v2097_v0, %v2444_v10  ;;  %v1956_v13 = vpack.c.bf16 %v2097_v0, %v2450_v12 }
  0xac   : > { %1931 = vmatprep.subr.bf16.mxu0 %v1930_v49 }
  0xaf   : > { %1933 = vmatpush1.bf16.msra.mxu0 %v1932_v52  ;;  %v1015_v52 = vrot.slane %v1882_v41, %v2232_v5 }
  0xb0   : > { %1935 = vmatprep.subr.bf16.mxu0 %v2411_v53  ;;  %v689_v15 = vpop.permute.xlu0 %688 }
  0xb3   : > { %1937 = vmatpush1.bf16.msra.mxu0 %v2417_v55 }
  0xb4   : > { %1939 = vmatprep.subr.bf16.mxu0 %v2107_v26 }
  0xb7   : > { %1941 = vmatpush1.bf16.msra.mxu0 %v2107_v26 }
  0xb8   : > { %1943 = vmatprep.subr.bf16.mxu0 %v1942_v60  ;;  %v1019_v60 = vrot.slane %v1882_v41, %v2234_v6 }
  0xbb   : > { %1945 = vmatpush1.bf16.msra.mxu0 %v1944_v63  ;;  %v1883_v63 = vld [vmem:[%s2807_s1 + $0x2] ss:$8 sm:$0x3] }
  0xbc   : > { %1947 = vmatprep.subr.bf16.mxu0 %v2435_v3 }
  0xbf   : > { %1949 = vmatpush1.bf16.msra.mxu0 %v2441_v7 }
  0xc0   : > { %1951 = vmatprep.subr.bf16.mxu0 %v2107_v26 }
  0xc3   : > { %1953 = vmatpush1.bf16.msra.mxu0 %v2107_v26 }
  0xc4   : > { %1955 = vmatprep.subr.bf16.mxu0 %v1954_v11 }
  0xc7   : > { %1957 = vmatpush1.bf16.msra.mxu0 %v1956_v13 }
  0xc8   : > { %803 = vmatprep.subr.mxu0 %v2097_v0 }
  0xcb   : > { %804 = vmatpush1.msra.mxu0 %v2097_v0 }
  0xcc   : > { %816 = vmatmul.mubr.f32.vlgmr.msra.gmra.mrb[0].mxu0 %v691_v14 }
 0x19f   : > { %v817_v20 = vpop.f32.mrb[0].mxu0 }
 0x1a0   : > { %v822_v21 = vadd.f32 %v817_v20, %v689_v15  ;;  %v819_v22 = vpop.f32.mrb[1].mxu0 }
 0x1a1   : > { %v823_v24 = vadd.f32 %v819_v22, %v689_v15 }
 0x1a2   : > { %v824_v26 = vmax.f32 %v822_v21, 0.0  ;;  %v1037_v21 = vrot.slane %v1883_v63, %v2232_v5 }
 0x1a3   : > { %v825_v27 = vmax.f32 %v823_v24, 0.0  ;;  %v1041_v24 = vrot.slane %v1883_v63, %v2234_v6 }
 0x1a4   : > { %1004 = vrot.lane.b32.xlu0 %v824_v26, %s2098_s28  ;;  %982 = vrot.lane.b32.xlu1 %v824_v26, %s2099_s29  ;;  %v2470_v30 = vmul.f32 %v1075_v23, %v824_v26 }
 0x1a5   : > { %831 = vmatprep.subr.mxu1 %v825_v27  ;;  %v2472_v32 = vmul.f32 %v1079_v25, %v825_v27 }
 0x1a6   : > { %832 = vmatpush1.msra.mxu1 %v824_v26 }
 0x1a7   : > { %1878 = vmatmul.mubr.msk.f32.vlgmr.msra.gmra.mrb[0].mxu1 %vm827_vm9, %v826_v29  ;;  %1879 = vmatprep.subr.msk.mxu1 %vm906_vm10, %v2222_v2  ;;  %v1181_v2 = vld [vmem:[%s2809_s3 + $0x8] sm:$0xff] }
 0x1a8   : > { %1026 = vrot.lane.b32.xlu0 %v824_v26, %s2100_s30  ;;  %984 = vrot.lane.b32.xlu1 %v825_v27, %s2099_s29 }
 0x1a9   : > { %1880 = vmatpush1.msk.msra.mxu1 %vm906_vm10, %v2214_v1  ;;  %975 = vmatprep.mubr.f32.mxu1 %v2097_v0  ;;  %v1174_v1 = vld [vmem:[%s2812_s6] sm:$0xff] }
 0x1ac   : > { %1048 = vrot.lane.b32.xlu0 %v824_v26, %s2101_s15  ;;  %1006 = vrot.lane.b32.xlu1 %v825_v27, %s2098_s28 }
 0x1af   : > { %1881 = vmatmul.mubr.msk.f32.vlgmr.msra.gmra.mrb[0].mxu1 %vm902_vm11, %v469_v33 }
 0x1b0   : > { %1086 = vrot.lane.b32.xlu0 %v824_v26, %s2102_s16  ;;  %1028 = vrot.lane.b32.xlu1 %v825_v27, %s2100_s30 }
 0x1b1   : > { %1890 = vmatprep.mubr.msk.f32.mxu1 %vm747_vm0, %v1181_v2 }
 0x1b4   : > { %1108 = vrot.lane.b32.xlu0 %v824_v26, %s2103_s17  ;;  %1050 = vrot.lane.b32.xlu1 %v825_v27, %s2101_s15 }
 0x1b8   : > { %1130 = vrot.lane.b32.xlu0 %v824_v26, %s2104_s18  ;;  %1088 = vrot.lane.b32.xlu1 %v825_v27, %s2102_s16 }
 0x1bc   : > { %1152 = vrot.lane.b32.xlu0 %v824_v26, %s2105_s19  ;;  %1110 = vrot.lane.b32.xlu1 %v825_v27, %s2103_s17 }
 0x1c0   : > { %1177 = vperm.xlu0 %2086, %v1174_v1   ;;  %1132 = vrot.lane.b32.xlu1 %v825_v27, %s2104_s18 }
 0x1c4   : > { %1154 = vrot.lane.b32.xlu1 %v825_v27, %s2105_s19 }
 0x216   : > { %v1005_v35 = vpop.permute.xlu0 %1004  ;;  %v983_v36 = vpop.permute.xlu1 %982 }
 0x21a   : > { %v1027_v42 = vpop.permute.xlu0 %1026  ;;  %v985_v43 = vpop.permute.xlu1 %984 }
 0x21b   : > { %v986_v44 = vsel %vm479_vm2, %v983_v36, %v985_v43  ;;  %v987_v45 = vsel %vm479_vm2, %v985_v43, %v983_v36 }
 0x21c   : > { %v1000_v46 = vmul.f32 %v993_v37, %v987_v45  ;;  %v1001_v49 = vmul.f32 %v997_v38, %v986_v44  ;;  %v1097_v38 = vrot.slane %v1886_v34, %v2232_v5  ;;  %v1101_v44 = vrot.slane %v1886_v34, %v2234_v6  ;;  %v1887_v45 = vld [vmem:[%s2807_s1 + $0x6] ss:$8 sm:$0x3] }
 0x21e   : > { %v1049_v11 = vpop.permute.xlu0 %1048  ;;  %v1007_v13 = vpop.permute.xlu1 %1006  ;;  %v1958_v14 = vpack.c.bf16 %v1001_v49, %v2320_v57  ;;  %v1960_v15 = vpack.c.bf16 %v1000_v46, %v2322_v58  ;;  %v1884_v57 = vld [vmem:[%s2807_s1 + $0x3] ss:$8 sm:$0x3] }
 0x21f   : > { %v1008_v19 = vsel %vm502_vm1, %v1005_v35, %v1007_v13  ;;  %v1009_v20 = vsel %vm502_vm1, %v1007_v13, %v1005_v35  ;;  %v1059_v27 = vrot.slane %v1884_v57, %v2232_v5  ;;  %v1063_v2 = vrot.slane %v1884_v57, %v2234_v6 }
 0x220   : > { %v2526_v22 = vmul.f32 %v1015_v52, %v1009_v20  ;;  %v2528_v23 = vmul.f32 %v1019_v60, %v1008_v19  ;;  %1959 = vmatprep.subr.bf16.mxu1 %v1958_v14  ;;  %2011 = vmatprep.subr.bf16.mxu0 %v1958_v14  ;;  %v1119_v13 = vrot.slane %v1887_v45, %v2232_v5 }
 0x221   : > { %1961 = vmatpush1.bf16.msra.mxu1 %v1960_v15  ;;  %2013 = vmatpush1.bf16.msra.mxu0 %v1960_v15  ;;  %v1123_v14 = vrot.slane %v1887_v45, %v2234_v6  ;;  %v1888_v15 = vld [vmem:[%s2807_s1 + $0x7] ss:$8 sm:$0x3] }
 0x222   : > { %v1029_v58 = vpop.permute.xlu1 %1028  ;;  %1963 = vmatprep.subr.bf16.mxu1 %v2338_v8  ;;  %v1087_v29 = vpop.permute.xlu0 %1086  ;;  %v1966_v8 = vpack.c.bf16 %v2097_v0, %v2528_v23  ;;  %v1968_v41 = vpack.c.bf16 %v2097_v0, %v2526_v22 }
 0x223   : > { %v1030_v25 = vsel %vm526_vm3, %v1027_v42, %v1029_v58  ;;  %v1031_v26 = vsel %vm526_vm3, %v1029_v58, %v1027_v42 }
 0x224   : > { %v1044_v33 = vmul.f32 %v1037_v21, %v1031_v26  ;;  %v1045_v1 = vmul.f32 %v1041_v24, %v1030_v25  ;;  %v1141_v21 = vrot.slane %v1888_v15, %v2232_v5  ;;  %v1145_v25 = vrot.slane %v1888_v15, %v2234_v6 }
 0x225   : > { %1965 = vmatpush1.bf16.msra.mxu1 %v2349_v17 }
 0x226   : > { %v1051_v35 = vpop.permute.xlu1 %1050  ;;  %1967 = vmatprep.subr.bf16.mxu1 %v1966_v8  ;;  %v2560_v17 = vpack.c.bf16 %v1045_v1, %v2351_v18  ;;  %v1109_v46 = vpop.permute.xlu0 %1108  ;;  %v2571_v63 = vpack.c.bf16 %v1044_v33, %v2367_v28 }
 0x227   : > { %v1052_v36 = vsel %vm550_vm4, %v1049_v11, %v1051_v35  ;;  %v1053_v37 = vsel %vm550_vm4, %v1051_v35, %v1049_v11 }
 0x228   : > { %v2554_v42 = vmul.f32 %v1059_v27, %v1053_v37  ;;  %v2556_v43 = vmul.f32 %v1063_v2, %v1052_v36  ;;  %v2604_v2 = vpack.c.bf16 %v2472_v32, %v2396_v48  ;;  %v2619_v32 = vpack.c.bf16 %v2470_v30, %v2402_v50 }
 0x229   : > { %1969 = vmatpush1.bf16.msra.mxu1 %v1968_v41 }
 0x22a   : > { %v1089_v49 = vpop.permute.xlu1 %1088  ;;  %1971 = vmatprep.subr.bf16.mxu1 %v2560_v17  ;;  %v1131_v24 = vpop.permute.xlu0 %1130  ;;  %v1978_v26 = vpack.c.bf16 %v2097_v0, %v2556_v43  ;;  %v1980_v1 = vpack.c.bf16 %v2097_v0, %v2554_v42 }
 0x22b   : > { %v1090_v52 = vsel %vm593_vm5, %v1087_v29, %v1089_v49  ;;  %v1091_v60 = vsel %vm593_vm5, %v1089_v49, %v1087_v29 }
 0x22c   : > { %v2573_v18 = vmul.f32 %v1097_v38, %v1090_v52  ;;  %v2575_v11 = vmul.f32 %v1101_v44, %v1091_v60 }
 0x22d   : > { %1973 = vmatpush1.bf16.msra.mxu1 %v2571_v63 }
 0x22e   : > { %v1111_v19 = vpop.permute.xlu1 %1110  ;;  %1975 = vmatprep.subr.bf16.mxu1 %v2383_v39  ;;  %v1889_v39 = vld [vmem:[%s2807_s1 + $0x10] ss:$8 sm:$0x3]  ;;  %v1153_v36 = vpop.permute.xlu0 %1152  ;;  %v1990_v45 = vpack.c.bf16 %v2097_v0, %v2575_v11 }
 0x22f   : > { %v1112_v28 = vsel %vm617_vm6, %v1109_v46, %v1111_v19  ;;  %v1113_v20 = vsel %vm617_vm6, %v1111_v19, %v1109_v46  ;;  %v1167_v35 = vrot.slane %v1889_v39, %v2234_v6  ;;  %v1992_v46 = vpack.c.bf16 %v2097_v0, %v2573_v18 }
 0x230   : > { %v1126_v57 = vmul.f32 %v1119_v13, %v1112_v28  ;;  %v1127_v58 = vmul.f32 %v1123_v14, %v1113_v20 }
 0x231   : > { %1977 = vmatpush1.bf16.msra.mxu1 %v2393_v47  ;;  %v1163_v47 = vrot.slane %v1889_v39, %v2232_v5 }
 0x232   : > { %v1133_v27 = vpop.permute.xlu1 %1132  ;;  %1979 = vmatprep.subr.bf16.mxu1 %v1978_v26  ;;  %v2629_v49 = vpack.c.bf16 %v1127_v58, %v2420_v56  ;;  %v2633_v50 = vpack.c.bf16 %v1126_v57, %v2426_v61  ;;  %v1314_v57 = vld [vmem:[%s2816_s10] sm:$0xf] }
 0x233   : > { %v1134_v29 = vsel %vm641_vm7, %v1131_v24, %v1133_v27  ;;  %v1135_v33 = vsel %vm641_vm7, %v1133_v27, %v1131_v24  ;;  %v1583_v24 = vld [vmem:[%s2813_s7] sm:$0xff] }
 0x234   : > { %v2606_v34 = vmul.f32 %v1141_v21, %v1134_v29  ;;  %v2608_v8 = vmul.f32 %v1145_v25, %v1135_v33  ;;  %v1590_v21 = vld [vmem:[%s2810_s4 + $0x8] sm:$0xff] }
 0x235   : > { %1981 = vmatpush1.bf16.msra.mxu1 %v1980_v1  ;;  %1900 = vmatprep.mubr.msk.f32.mxu0 %vm747_vm0, %v1590_v21  ;;  %v1397_v58 = vld [vmem:[%s2807_s1] ss:$8 sm:$0x3]  ;;  %v1892_v27 = vld [vmem:[%s2807_s1 + $0x1] ss:$8 sm:$0x3] }
 0x236   : > { %v1155_v37 = vpop.permute.xlu1 %1154  ;;  %1983 = vmatprep.subr.bf16.mxu1 %v2604_v2  ;;  %v1402_v25 = vrot.slane %v1397_v58, %v2232_v5  ;;  %v1406_v26 = vrot.slane %v1397_v58, %v2234_v6  ;;  %v1896_v21 = vld [vmem:[%s2807_s1 + $0x5] ss:$8 sm:$0x3] }
 0x237   : > { %v1156_v38 = vsel %vm665_vm8, %v1153_v36, %v1155_v37  ;;  %v1157_v48 = vsel %vm665_vm8, %v1155_v37, %v1153_v36  ;;  %v1428_v36 = vrot.slane %v1892_v27, %v2234_v6  ;;  %v1506_v58 = vrot.slane %v1896_v21, %v2232_v5 }
 0x238   : > { %v1170_v41 = vmul.f32 %v1163_v47, %v1156_v38  ;;  %v1171_v44 = vmul.f32 %v1167_v35, %v1157_v48  ;;  %v1424_v35 = vrot.slane %v1892_v27, %v2232_v5  ;;  %v1893_v38 = vld [vmem:[%s2807_s1 + $0x2] ss:$8 sm:$0x3]  ;;  %v1897_v27 = vld [vmem:[%s2807_s1 + $0x6] ss:$8 sm:$0x3] }
 0x239   : > { %1985 = vmatpush1.bf16.msra.mxu1 %v2619_v32 }
 0x23a   : > { %1987 = vmatprep.subr.bf16.mxu1 %v2411_v53  ;;  %v2002_v53 = vpack.c.bf16 %v2097_v0, %v2608_v8  ;;  %v2643_v56 = vpack.c.bf16 %v1171_v44, %v2444_v10  ;;  %v2647_v61 = vpack.c.bf16 %v1170_v41, %v2450_v12 }
 0x23d   : > { %1989 = vmatpush1.bf16.msra.mxu1 %v2417_v55  ;;  %v2004_v55 = vpack.c.bf16 %v2097_v0, %v2606_v34 }
 0x23e   : > { %1991 = vmatprep.subr.bf16.mxu1 %v1990_v45 }
 0x23f   : > { %v1178_v10 = vpop.permute.xlu0 %1177 }
 0x241   : > { %1993 = vmatpush1.bf16.msra.mxu1 %v1992_v46 }
 0x242   : > { %1995 = vmatprep.subr.bf16.mxu1 %v2629_v49 }
 0x245   : > { %1997 = vmatpush1.bf16.msra.mxu1 %v2633_v50 }
 0x246   : > { %1999 = vmatprep.subr.bf16.mxu1 %v2435_v3  ;;  %v1180_v3 = vld [vmem:[%s2809_s3] sm:$0xff] }
 0x249   : > { %2001 = vmatpush1.bf16.msra.mxu1 %v2441_v7  ;;  %v1895_v7 = vld [vmem:[%s2807_s1 + $0x4] ss:$8 sm:$0x3] }
 0x24a   : > { %2003 = vmatprep.subr.bf16.mxu1 %v2002_v53  ;;  %v1484_v60 = vrot.slane %v1895_v7, %v2232_v5  ;;  %v1488_v14 = vrot.slane %v1895_v7, %v2234_v6  ;;  %v1450_v7 = vrot.slane %v1893_v38, %v2234_v6 }
 0x24d   : > { %2005 = vmatpush1.bf16.msra.mxu1 %v2004_v55 }
 0x24e   : > { %2007 = vmatprep.subr.bf16.mxu1 %v2643_v56 }
 0x251   : > { %2009 = vmatpush1.bf16.msra.mxu1 %v2647_v61 }
 0x252   : > { %1291 = vmatprep.subr.mxu1 %v2097_v0 }
 0x255   : > { %1292 = vmatpush1.msra.mxu1 %v2097_v0 }
 0x256   : > { %1304 = vmatmul.mubr.f32.vlgmr.msra.gmra.mrb[2].mxu1 %v1180_v3  ;;  %v1446_v3 = vrot.slane %v1893_v38, %v2232_v5  ;;  %v1532_v38 = vrot.slane %v1897_v27, %v2234_v6 }
 0x257   : > { %1382 = vmatprep.mubr.f32.mxu1 %v2097_v0 }
 0x329   : > { %v1305_v12 = vpop.f32.mrb[2].mxu1 }
 0x32a   : > { %v1310_v30 = vadd.f32 %v1305_v12, %v1178_v10  ;;  %v1307_v52 = vpop.f32.mrb[3].mxu1 }
 0x32b   : > { %v1311_v13 = vadd.f32 %v1307_v52, %v1178_v10 }
 0x32c   : > { %v1312_v15 = vmax.f32 %v1310_v30, 0.0 }
 0x32d   : > { %v1313_v19 = vmax.f32 %v1311_v13, 0.0 }
 0x32e   : > { %1391 = vrot.lane.b32.xlu1 %v1312_v15, %s2099_s29  ;;  %v2662_v28 = vmul.f32 %v1484_v60, %v1312_v15 }
 0x32f   : > { %1393 = vrot.lane.b32.xlu0 %v1313_v19, %s2099_s29  ;;  %1318 = vmatprep.subr.mxu1 %v1313_v19  ;;  %v2665_v20 = vmul.f32 %v1488_v14, %v1313_v19 }
 0x330   : > { %1319 = vmatpush1.msra.mxu1 %v1312_v15 }
 0x331   : > { %1891 = vmatmul.mubr.msk.f32.vlgmr.msra.gmra.mrb[0].mxu1 %vm827_vm9, %v1314_v57 }
 0x332   : > { %1413 = vrot.lane.b32.xlu1 %v1312_v15, %s2098_s28  ;;  %1791 = vmatprep.mubr.f32.mxu1 %v2097_v0 }
 0x333   : > { %1415 = vrot.lane.b32.xlu0 %v1313_v19, %s2098_s28 }
 0x336   : > { %1435 = vrot.lane.b32.xlu1 %v1312_v15, %s2100_s30 }
 0x337   : > { %1437 = vrot.lane.b32.xlu0 %v1313_v19, %s2100_s30 }
 0x33a   : > { %1457 = vrot.lane.b32.xlu1 %v1312_v15, %s2101_s15 }
 0x33b   : > { %1459 = vrot.lane.b32.xlu0 %v1313_v19, %s2101_s15 }
 0x33e   : > { %1495 = vrot.lane.b32.xlu1 %v1312_v15, %s2102_s16 }
 0x33f   : > { %1497 = vrot.lane.b32.xlu0 %v1313_v19, %s2102_s16 }
 0x342   : > { %1517 = vrot.lane.b32.xlu1 %v1312_v15, %s2103_s17 }
 0x343   : > { %1519 = vrot.lane.b32.xlu0 %v1313_v19, %s2103_s17 }
 0x346   : > { %1539 = vrot.lane.b32.xlu1 %v1312_v15, %s2104_s18 }
 0x347   : > { %1541 = vrot.lane.b32.xlu0 %v1313_v19, %s2104_s18 }
 0x34a   : > { %1561 = vrot.lane.b32.xlu1 %v1312_v15, %s2105_s19 }
 0x34b   : > { %1563 = vrot.lane.b32.xlu0 %v1313_v19, %s2105_s19 }
 0x34e   : > { %1586 = vperm.xlu1 %2087, %v1583_v24  }
 0x3a0   : > { %v1392_v39 = vpop.permute.xlu1 %1391 }
 0x3a1   : > { %v1394_v29 = vpop.permute.xlu0 %1393 }
 0x3a2   : > { %v1395_v33 = vsel %vm479_vm2, %v1392_v39, %v1394_v29  ;;  %v1396_v0 = vsel %vm479_vm2, %v1394_v29, %v1392_v39  ;;  %v1510_v39 = vrot.slane %v1896_v21, %v2234_v6 }
 0x3a3   : > { %v1409_v1 = vmul.f32 %v1402_v25, %v1396_v0  ;;  %v1410_v47 = vmul.f32 %v1406_v26, %v1395_v33 }
 0x3a4   : > { %v1414_v37 = vpop.permute.xlu1 %1413 }
 0x3a5   : > { %v1416_v48 = vpop.permute.xlu0 %1415  ;;  %v2014_v41 = vpack.c.bf16 %v2324_v59, %v1410_v47  ;;  %v2016_v44 = vpack.c.bf16 %v2340_v9, %v1409_v1  ;;  %v1894_v59 = vld [vmem:[%s2807_s1 + $0x3] ss:$8 sm:$0x3]  ;;  %v1528_v47 = vrot.slane %v1897_v27, %v2232_v5 }
 0x3a6   : > { %v1417_v45 = vsel %vm502_vm1, %v1414_v37, %v1416_v48  ;;  %v1418_v46 = vsel %vm502_vm1, %v1416_v48, %v1414_v37  ;;  %v1468_v15 = vrot.slane %v1894_v59, %v2232_v5  ;;  %v1472_v19 = vrot.slane %v1894_v59, %v2234_v6 }
 0x3a7   : > { %v1431_v53 = vmul.f32 %v1424_v35, %v1418_v46  ;;  %v1432_v55 = vmul.f32 %v1428_v36, %v1417_v45  ;;  %2015 = vmatprep.subr.bf16.mxu0 %v2014_v41 }
 0x3a8   : > { %v1436_v10 = vpop.permute.xlu1 %1435  ;;  %2017 = vmatpush1.bf16.msra.mxu0 %v2016_v44 }
 0x3a9   : > { %v1438_v9 = vpop.permute.xlu0 %1437  ;;  %v2018_v12 = vpack.c.bf16 %v1432_v55, %v2528_v23  ;;  %v2020_v30 = vpack.c.bf16 %v1431_v53, %v2526_v22 }
 0x3aa   : > { %v1439_v52 = vsel %vm526_vm3, %v1436_v10, %v1438_v9  ;;  %v1440_v60 = vsel %vm526_vm3, %v1438_v9, %v1436_v10  ;;  %v2038_v9 = vpack.c.bf16 %v2404_v51, %v2665_v20  ;;  %v2040_v51 = vpack.c.bf16 %v2413_v54, %v2662_v28 }
 0x3ab   : > { %v1453_v13 = vmul.f32 %v1446_v3, %v1440_v60  ;;  %v1454_v14 = vmul.f32 %v1450_v7, %v1439_v52  ;;  %2019 = vmatprep.subr.bf16.mxu0 %v2018_v12  ;;  %v1899_v7 = vld [vmem:[%s2807_s1 + $0x10] ss:$8 sm:$0x3] }
 0x3ac   : > { %v1458_v23 = vpop.permute.xlu1 %1457  ;;  %2021 = vmatpush1.bf16.msra.mxu0 %v2020_v30  ;;  %v1572_v52 = vrot.slane %v1899_v7, %v2232_v5  ;;  %v1576_v60 = vrot.slane %v1899_v7, %v2234_v6 }
 0x3ad   : > { %v1460_v22 = vpop.permute.xlu0 %1459  ;;  %2023 = vmatprep.subr.bf16.mxu0 %v2560_v17  ;;  %v2026_v29 = vpack.c.bf16 %v2369_v31, %v1454_v14  ;;  %v2028_v35 = vpack.c.bf16 %v2385_v40, %v1453_v13 }
 0x3ae   : > { %v1461_v24 = vsel %vm550_vm4, %v1458_v23, %v1460_v22  ;;  %v1462_v57 = vsel %vm550_vm4, %v1460_v22, %v1458_v23 }
 0x3af   : > { %v1475_v25 = vmul.f32 %v1468_v15, %v1462_v57  ;;  %v1476_v26 = vmul.f32 %v1472_v19, %v1461_v24 }
 0x3b0   : > { %v1496_v33 = vpop.permute.xlu1 %1495  ;;  %2025 = vmatpush1.bf16.msra.mxu0 %v2571_v63  ;;  %v1898_v63 = vld [vmem:[%s2807_s1 + $0x7] ss:$8 sm:$0x3] }
 0x3b1   : > { %v1498_v17 = vpop.permute.xlu0 %1497  ;;  %2027 = vmatprep.subr.bf16.mxu0 %v2026_v29  ;;  %v2030_v31 = vpack.c.bf16 %v1476_v26, %v2556_v43  ;;  %v2032_v45 = vpack.c.bf16 %v1475_v25, %v2554_v42  ;;  %v1550_v43 = vrot.slane %v1898_v63, %v2232_v5  ;;  %v1554_v55 = vrot.slane %v1898_v63, %v2234_v6 }
 0x3b2   : > { %v1499_v0 = vsel %vm593_vm5, %v1496_v33, %v1498_v17  ;;  %v1500_v1 = vsel %vm593_vm5, %v1498_v17, %v1496_v33 }
 0x3b3   : > { %v1513_v36 = vmul.f32 %v1506_v58, %v1499_v0  ;;  %v1514_v37 = vmul.f32 %v1510_v39, %v1500_v1 }
 0x3b4   : > { %v1518_v48 = vpop.permute.xlu1 %1517  ;;  %2029 = vmatpush1.bf16.msra.mxu0 %v2028_v35 }
 0x3b5   : > { %v1520_v41 = vpop.permute.xlu0 %1519  ;;  %2031 = vmatprep.subr.bf16.mxu0 %v2030_v31  ;;  %v2042_v5 = vpack.c.bf16 %v1514_v37, %v2575_v11  ;;  %v2044_v6 = vpack.c.bf16 %v1513_v36, %v2573_v18 }
 0x3b6   : > { %v1521_v44 = vsel %vm617_vm6, %v1518_v48, %v1520_v41  ;;  %v1522_v40 = vsel %vm617_vm6, %v1520_v41, %v1518_v48 }
 0x3b7   : > { %v1535_v46 = vmul.f32 %v1528_v47, %v1521_v44  ;;  %v1536_v53 = vmul.f32 %v1532_v38, %v1522_v40 }
 0x3b8   : > { %v1540_v3 = vpop.permute.xlu1 %1539  ;;  %2033 = vmatpush1.bf16.msra.mxu0 %v2032_v45 }
 0x3b9   : > { %v1542_v10 = vpop.permute.xlu0 %1541  ;;  %2035 = vmatprep.subr.bf16.mxu0 %v2604_v2  ;;  %v2052_v16 = vpack.c.bf16 %v2437_v4, %v1535_v46 }
 0x3ba   : > { %v1543_v59 = vsel %vm641_vm7, %v1540_v3, %v1542_v10  ;;  %v1544_v42 = vsel %vm641_vm7, %v1542_v10, %v1540_v3 }
 0x3bb   : > { %v1557_v12 = vmul.f32 %v1550_v43, %v1543_v59  ;;  %v1558_v30 = vmul.f32 %v1554_v55, %v1544_v42 }
 0x3bc   : > { %v1562_v13 = vpop.permute.xlu1 %1561  ;;  %2037 = vmatpush1.bf16.msra.mxu0 %v2619_v32  ;;  %v2050_v32 = vpack.c.bf16 %v2428_v62, %v1536_v53  ;;  %v1589_v62 = vld [vmem:[%s2810_s4] sm:$0xff] }
 0x3bd   : > { %v1564_v14 = vpop.permute.xlu0 %1563  ;;  %2039 = vmatprep.subr.bf16.mxu0 %v2038_v9  ;;  %v2054_v54 = vpack.c.bf16 %v1558_v30, %v2608_v8  ;;  %v2056_v11 = vpack.c.bf16 %v1557_v12, %v2606_v34 }
 0x3be   : > { %v1565_v2 = vsel %vm665_vm8, %v1562_v13, %v1564_v14  ;;  %v1566_v15 = vsel %vm665_vm8, %v1564_v14, %v1562_v13 }
 0x3bf   : > { %v1579_v20 = vmul.f32 %v1572_v52, %v1565_v2  ;;  %v1580_v19 = vmul.f32 %v1576_v60, %v1566_v15 }
 0x3c0   : > { %2041 = vmatpush1.bf16.msra.mxu0 %v2040_v51 }
 0x3c1   : > { %2043 = vmatprep.subr.bf16.mxu0 %v2042_v5 }
 0x3c4   : > { %2045 = vmatpush1.bf16.msra.mxu0 %v2044_v6 }
 0x3c5   : > { %2047 = vmatprep.subr.bf16.mxu0 %v2629_v49 }
 0x3c8   : > { %2049 = vmatpush1.bf16.msra.mxu0 %v2633_v50 }
 0x3c9   : > { %2051 = vmatprep.subr.bf16.mxu0 %v2050_v32 }
 0x3cc   : > { %2053 = vmatpush1.bf16.msra.mxu0 %v2052_v16 }
 0x3cd   : > { %2055 = vmatprep.subr.bf16.mxu0 %v2054_v54  ;;  %v1587_v4 = vpop.permute.xlu1 %1586 }
 0x3d0   : > { %2057 = vmatpush1.bf16.msra.mxu0 %v2056_v11 }
 0x3d1   : > { %2059 = vmatprep.subr.bf16.mxu0 %v2643_v56  ;;  %v1723_v56 = vld [vmem:[%s2817_s11] sm:$0xf] }
 0x3d4   : > { %2061 = vmatpush1.bf16.msra.mxu0 %v2647_v61 }
 0x3d5   : > { %1700 = vmatprep.subr.mxu0 %v1580_v19 }
 0x3d8   : > { %1701 = vmatpush1.msra.mxu0 %v1579_v20 }
 0x3d9   : > { %1713 = vmatmul.mubr.f32.vlgmr.msra.gmra.mrb[2].mxu0 %v1589_v62 }
 0x4ac   : > { %v1714_v18 = vpop.f32.mrb[2].mxu0 }
 0x4ad   : > { %v1719_v8 = vadd.f32 %v1714_v18, %v1587_v4  ;;  %v1716_v49 = vpop.f32.mrb[3].mxu0 }
 0x4ae   : > { %v1720_v50 = vadd.f32 %v1716_v49, %v1587_v4 }
 0x4af   : > { %v1721_v34 = vmax.f32 %v1719_v8, 0.0 }
 0x4b0   : > { %v1722_v28 = vmax.f32 %v1720_v50, 0.0 }
 0x4b2   : > { %1727 = vmatprep.subr.mxu1 %v1722_v28 }
 0x4b3   : > { %1728 = vmatpush1.msra.mxu1 %v1721_v34 }
 0x4b4   : > { %1901 = vmatmul.mubr.msk.f32.vlgmr.msra.gmra.mrb[0].mxu1 %vm827_vm9, %v1723_v56 }
 0x587   : > { %v1793_v61 = vpop.f32.mrb[0].mxu1 }
 0x588   : > { %v1795_v21 = vpop.f32.mrb[1].mxu1 }
 0x589   : > { %v1802_v23 = vcombine.low %v1793_v61, %v1795_v21 }
 0x58b   : > { %1804 = vst [vmem:[%s413_s23] sm:$0xff] %v1802_v23 }
 0x58c PF: > { %s22_s21 = sadd.s32 1, %s2095_s21  }
 0x58d   : > { %p19_p4 = scmp.ge.s32.totalorder %s22_s21, 4  }
 0x58f   :  { %21 = sbr.rel (!%p19_p4) target bundleno = 1 (0x1), region = 106 }

</bundles_post_ra>
